<compile_context>
chip_gen: v6e
topology: v6e:2x2x1
jax: 0.10.0
libtpu: 0.0.40
codegen_flags: <defaults>
</compile_context>

<pallas_src>
import functools

import numpy as np
import jax
import jax.numpy as jnp
from jax.experimental import pallas as pl
from jax.experimental.pallas import tpu as pltpu

BN_EPS = 1e-3  # ultralytics ConvBnAct uses eps=0.001


# ----------------------------- parameter setup ------------------------------

def init_convbn(key, cout, cin, k):
    """Deterministic Conv2d(bias=False) + BatchNorm2d parameters."""
    k1, k2, k3, k4, k5 = jax.random.split(key, 5)
    w = jax.random.normal(k1, (cout, cin, k, k), jnp.float32) / np.sqrt(cin * k * k)
    gamma = 1.0 + 0.1 * jax.random.normal(k2, (cout,), jnp.float32)
    beta = 0.1 * jax.random.normal(k3, (cout,), jnp.float32)
    mean = 0.1 * jax.random.normal(k4, (cout,), jnp.float32)
    var = jnp.abs(jax.random.normal(k5, (cout,), jnp.float32)) + 0.5
    return dict(w=w, gamma=gamma, beta=beta, mean=mean, var=var)


def fold_bn(p):
    """Fold BN into the conv: returns (W_folded [Cout,Cin,kh,kw], bias [Cout])."""
    scale = p["gamma"] / jnp.sqrt(p["var"] + BN_EPS)
    wf = p["w"] * scale[:, None, None, None]
    bf = p["beta"] - p["mean"] * scale
    return wf, bf


def _tap_masks(h, w):
    """(9, H*W) validity masks for the 3x3 taps in (dy, dx) row-major order."""
    masks = np.zeros((9, h * w), np.float32)
    t = 0
    for dy in (-1, 0, 1):
        for dx in (-1, 0, 1):
            m = np.zeros((h, w), np.float32)
            m[max(0, -dy):min(h, h - dy), max(0, -dx):min(w, w - dx)] = 1.0
            masks[t] = m.reshape(-1)
            t += 1
    return jnp.asarray(masks)


_TAPS = tuple((dy, dx) for dy in (-1, 0, 1) for dx in (-1, 0, 1))


# ------------------------------ Pallas kernel --------------------------------

def _c2f_kernel(*refs, n, shortcut, img_w, hw):
    # refs = (x, masks, w1, b1, [mw1, mb1, mw2, mb2 if n>0], w2s, b2, out)
    x_ref, mask_ref, w1_ref, b1_ref = refs[:4]
    idx = 4
    if n > 0:
        mw1_ref, mb1_ref, mw2_ref, mb2_ref = refs[idx:idx + 4]
        idx += 4
    w2s_ref, b2_ref, o_ref = refs[idx:idx + 3]

    x = x_ref[0]              # (C1, HW)   — HW on lanes (dense)
    masks = mask_ref[...]     # (9, HW)

    def conv3x3(w9, b, inp):
        """w9: (9, Cout, Cin) tap-major folded weights; inp: (Cin, HW)."""
        acc = None
        for t, (dy, dx) in enumerate(_TAPS):
            if dy == 0 and dx == 0:
                col = inp                                 # center tap: no shift/mask
            else:
                shift = (-(dy * img_w + dx)) % hw         # col[p] = inp[p + dy*W + dx]
                col = pltpu.roll(inp, shift, 1) * masks[t:t + 1, :]
            part = jnp.dot(w9[t], col, preferred_element_type=jnp.float32)
            acc = part if acc is None else acc + part
        return jnp.maximum(acc + b, 0.0)

    # cv1 (1x1 conv + folded BN + ReLU) and channel chunk.
    y = jnp.maximum(
        jnp.dot(w1_ref[...], x, preferred_element_type=jnp.float32) + b1_ref[...],
        0.0)                                              # (2c, HW)
    c = y.shape[0] // 2
    y0, y1 = y[:c], y[c:]

    # cv2 (1x1 conv over concat of chunks): accumulate contribution per chunk,
    # never materializing the concatenated activation.
    w2s = w2s_ref[...]                                    # (2+n, C2, c)
    out = jnp.dot(w2s[0], y0, preferred_element_type=jnp.float32)
    out = out + jnp.dot(w2s[1], y1, preferred_element_type=jnp.float32)

    # n YOLOBottlenecks applied to the last chunk; each result feeds cv2.
    cur = y1
    for i in range(n):
        t1 = conv3x3(mw1_ref[i], mb1_ref[i], cur)
        t2 = conv3x3(mw2_ref[i], mb2_ref[i], t1)
        if shortcut:
            t2 = t2 + cur
        cur = t2
        out = out + jnp.dot(w2s[2 + i], cur, preferred_element_type=jnp.float32)

    o_ref[0] = jnp.maximum(out + b2_ref[...], 0.0).astype(o_ref.dtype)


# ------------------------------- YOLOC2f forward ------------------------------

def _to_tap_major(wf):
    """(Cout, Cin, 3, 3) folded weight -> (9, Cout, Cin), (dy,dx) row-major."""
    cout, cin = wf.shape[0], wf.shape[1]
    return jnp.transpose(wf, (2, 3, 0, 1)).reshape(9, cout, cin)


def yoloc2f_forward(x_nchw, params, *, n, shortcut=False):
    N, C1, H, W = x_nchw.shape
    HW = H * W
    x = x_nchw.reshape(N, C1, HW)          # NCHW -> (N, C, H*W): pure reshape
    masks = _tap_masks(H, W)

    w1, b1 = fold_bn(params["cv1"])
    c2x = w1.shape[0]                      # 2*c
    c = c2x // 2
    w2, b2 = fold_bn(params["cv2"])
    C2 = w2.shape[0]
    # Split cv2 weight per chunk: (C2, (2+n)*c, 1, 1) -> (2+n, C2, c).
    w2s = jnp.transpose(w2[:, :, 0, 0].reshape(C2, 2 + n, c), (1, 0, 2))

    args = [x, masks, w1[:, :, 0, 0], b1.reshape(-1, 1)]
    in_specs = [
        pl.BlockSpec((1, C1, HW), lambda nb: (nb, 0, 0)),
        pl.BlockSpec((9, HW), lambda nb: (0, 0)),
        pl.BlockSpec((c2x, C1), lambda nb: (0, 0)),
        pl.BlockSpec((c2x, 1), lambda nb: (0, 0)),
    ]

    if n > 0:
        mw1, mb1, mw2, mb2 = [], [], [], []
        for i in range(n):
            wf1, bf1 = fold_bn(params[f"m{i}_cv1"])
            wf2, bf2 = fold_bn(params[f"m{i}_cv2"])
            mw1.append(_to_tap_major(wf1)); mb1.append(bf1.reshape(-1, 1))
            mw2.append(_to_tap_major(wf2)); mb2.append(bf2.reshape(-1, 1))
        mw1 = jnp.stack(mw1)               # (n, 9, ch, c)
        mb1 = jnp.stack(mb1)               # (n, ch, 1)
        mw2 = jnp.stack(mw2)               # (n, 9, c, ch)
        mb2 = jnp.stack(mb2)               # (n, c, 1)
        ch = mw1.shape[2]
        args += [mw1, mb1, mw2, mb2]
        in_specs += [
            pl.BlockSpec((n, 9, ch, c), lambda nb: (0, 0, 0, 0)),
            pl.BlockSpec((n, ch, 1), lambda nb: (0, 0, 0)),
            pl.BlockSpec((n, 9, c, ch), lambda nb: (0, 0, 0, 0)),
            pl.BlockSpec((n, c, 1), lambda nb: (0, 0, 0)),
        ]

    args += [w2s, b2.reshape(-1, 1)]
    in_specs += [
        pl.BlockSpec((2 + n, C2, c), lambda nb: (0, 0, 0)),
        pl.BlockSpec((C2, 1), lambda nb: (0, 0)),
    ]

    kernel = functools.partial(_c2f_kernel, n=n, shortcut=shortcut, img_w=W, hw=HW)
    out = pl.pallas_call(
        kernel,
        out_shape=jax.ShapeDtypeStruct((N, C2, HW), jnp.float32),
        grid=(N,),
        in_specs=in_specs,
        out_specs=pl.BlockSpec((1, C2, HW), lambda nb: (nb, 0, 0)),
        compiler_params=pltpu.CompilerParams(dimension_semantics=("parallel",)),
    )(*args)
    return out.reshape(N, C2, H, W)        # (N, C, H*W) -> NCHW: pure reshape


# ----------------------------- pure-JAX reference ----------------------------

def _ref_conv_bn_relu(x_nchw, p):
    wf, bf = fold_bn(p)
    y = jax.lax.conv_general_dilated(
        x_nchw, wf, window_strides=(1, 1), padding="SAME",
        dimension_numbers=("NCHW", "OIHW", "NCHW"))
    return jnp.maximum(y + bf[None, :, None, None], 0.0)


def yoloc2f_reference(x_nchw, params, *, n, shortcut=False):
    y = _ref_conv_bn_relu(x_nchw, params["cv1"])
    c = y.shape[1] // 2
    chunks = [y[:, :c], y[:, c:]]
    cur = chunks[-1]
    for i in range(n):
        t = _ref_conv_bn_relu(cur, params[f"m{i}_cv1"])
        out_i = _ref_conv_bn_relu(t, params[f"m{i}_cv2"])
        if shortcut:
            out_i = out_i + cur
        chunks.append(out_i)
        cur = out_i
    cat = jnp.concatenate(chunks, axis=1)
    return _ref_conv_bn_relu(cat, params["cv2"])


# ------------------------------------ main -----------------------------------

def _run_case(key, *, N, C1, H, W, C2, n, e, in_e, shortcut):
    c = int(C2 * e)
    c_hidden = int(c * in_e)
    keys = jax.random.split(key, 3 + 2 * n)
    x = jax.random.normal(keys[0], (N, C1, H, W), jnp.float32)

    params = {"cv1": init_convbn(keys[1], 2 * c, C1, 1)}
    for i in range(n):
        params[f"m{i}_cv1"] = init_convbn(keys[2 + 2 * i], c_hidden, c, 3)
        params[f"m{i}_cv2"] = init_convbn(keys[3 + 2 * i], c, c_hidden, 3)
    params["cv2"] = init_convbn(keys[2 + 2 * n], C2, (2 + n) * c, 1)

    out = yoloc2f_forward(x, params, n=n, shortcut=shortcut)
    jax.block_until_ready(out)
    assert out.shape == (N, C2, H, W), out.shape

    ref = yoloc2f_reference(x, params, n=n, shortcut=shortcut)
    np.testing.assert_allclose(np.asarray(out), np.asarray(ref),
                               rtol=1e-3, atol=1e-3)


if __name__ == "__main__":
    key = jax.random.PRNGKey(0)
    k1, k2 = jax.random.split(key)
    # Module defaults (shortcut=False, e=0.5, in_e=1.0, k=3), with n=2 to
    # exercise the chunk/append/concat chain of C2f.
    _run_case(k1, N=2, C1=16, H=16, W=16, C2=16, n=2, e=0.5, in_e=1.0,
              shortcut=False)
    # Shortcut variant (residual add inside the bottleneck).
    _run_case(k2, N=2, C1=16, H=16, W=16, C2=16, n=1, e=0.5, in_e=1.0,
              shortcut=True)
    print("KERNEL_OK")
</pallas_src>

<mosaic_0001>
module attributes {stable_mosaic.version = 11 : i64} {
  func.func @_c2f_kernel(%arg0: i32, %arg1: memref<1x16x256xf32, #tpu.memory_space<vmem>>, %arg2: memref<9x256xf32, #tpu.memory_space<vmem>>, %arg3: memref<16x16xf32, #tpu.memory_space<vmem>>, %arg4: memref<16x1xf32, #tpu.memory_space<vmem>>, %arg5: memref<2x9x8x8xf32, #tpu.memory_space<vmem>>, %arg6: memref<2x8x1xf32, #tpu.memory_space<vmem>>, %arg7: memref<2x9x8x8xf32, #tpu.memory_space<vmem>>, %arg8: memref<2x8x1xf32, #tpu.memory_space<vmem>>, %arg9: memref<4x16x8xf32, #tpu.memory_space<vmem>>, %arg10: memref<16x1xf32, #tpu.memory_space<vmem>>, %arg11: memref<1x16x256xf32, #tpu.memory_space<vmem>>) attributes {dimension_semantics = [#tpu.dimension_semantics<parallel>], iteration_bounds = array<i64: 2>, scalar_prefetch = 0 : i64, scratch_operands = 0 : i64, tpu.core_type = #tpu.core_type<tc>, window_params = [{transform_indices = @transform_0, window_bounds = array<i64: 1, 16, 256>}, {pipeline_mode = #tpu.pipeline_mode<synchronous>, transform_indices = @transform_1, window_bounds = array<i64: 9, 256>}, {pipeline_mode = #tpu.pipeline_mode<synchronous>, transform_indices = @transform_2, window_bounds = array<i64: 16, 16>}, {pipeline_mode = #tpu.pipeline_mode<synchronous>, transform_indices = @transform_3, window_bounds = array<i64: 16, 1>}, {pipeline_mode = #tpu.pipeline_mode<synchronous>, transform_indices = @transform_4, window_bounds = array<i64: 2, 9, 8, 8>}, {pipeline_mode = #tpu.pipeline_mode<synchronous>, transform_indices = @transform_5, window_bounds = array<i64: 2, 8, 1>}, {pipeline_mode = #tpu.pipeline_mode<synchronous>, transform_indices = @transform_6, window_bounds = array<i64: 2, 9, 8, 8>}, {pipeline_mode = #tpu.pipeline_mode<synchronous>, transform_indices = @transform_7, window_bounds = array<i64: 2, 8, 1>}, {pipeline_mode = #tpu.pipeline_mode<synchronous>, transform_indices = @transform_8, window_bounds = array<i64: 4, 16, 8>}, {pipeline_mode = #tpu.pipeline_mode<synchronous>, transform_indices = @transform_9, window_bounds = array<i64: 16, 1>}, {transform_indices = @transform_10, window_bounds = array<i64: 1, 16, 256>}]} {
    %c0 = arith.constant 0 : index
    %c0_0 = arith.constant 0 : index
    %c0_1 = arith.constant 0 : index
    %0 = vector.load %arg1[%c0, %c0_0, %c0_1] : memref<1x16x256xf32, #tpu.memory_space<vmem>>, vector<1x16x256xf32>
    %1 = vector.shape_cast %0 : vector<1x16x256xf32> to vector<16x256xf32>
    %c0_2 = arith.constant 0 : index
    %c0_3 = arith.constant 0 : index
    %2 = vector.load %arg2[%c0_2, %c0_3] : memref<9x256xf32, #tpu.memory_space<vmem>>, vector<9x256xf32>
    %c0_4 = arith.constant 0 : index
    %c0_5 = arith.constant 0 : index
    %3 = vector.load %arg3[%c0_4, %c0_5] : memref<16x16xf32, #tpu.memory_space<vmem>>, vector<16x16xf32>
    %cst = arith.constant dense<0.000000e+00> : vector<16x256xf32>
    %4 = tpu.matmul %3, %1, %cst {dimension_numbers = #tpu.dot_dimension_numbers<[1], [0], [0], [1], [0, 0, 1, 1], [], []>} : vector<16x16xf32>, vector<16x256xf32>, vector<16x256xf32> -> vector<16x256xf32>
    %c0_6 = arith.constant 0 : index
    %c0_7 = arith.constant 0 : index
    %5 = vector.load %arg4[%c0_6, %c0_7] : memref<16x1xf32, #tpu.memory_space<vmem>>, vector<16x1xf32>
    %6 = vector.broadcast %5 : vector<16x1xf32> to vector<16x256xf32>
    %7 = arith.addf %4, %6 : vector<16x256xf32>
    %cst_8 = arith.constant 0.000000e+00 : f32
    %8 = vector.broadcast %cst_8 : f32 to vector<16x256xf32>
    %9 = arith.maximumf %7, %8 : vector<16x256xf32>
    %10 = vector.extract_strided_slice %9 {offsets = [0, 0], sizes = [8, 256], strides = [1, 1]} : vector<16x256xf32> to vector<8x256xf32>
    %11 = vector.extract_strided_slice %9 {offsets = [8, 0], sizes = [8, 256], strides = [1, 1]} : vector<16x256xf32> to vector<8x256xf32>
    %c0_9 = arith.constant 0 : index
    %c0_10 = arith.constant 0 : index
    %c0_11 = arith.constant 0 : index
    %12 = vector.load %arg9[%c0_9, %c0_10, %c0_11] : memref<4x16x8xf32, #tpu.memory_space<vmem>>, vector<4x16x8xf32>
    %13 = vector.extract_strided_slice %12 {offsets = [0, 0, 0], sizes = [1, 16, 8], strides = [1, 1, 1]} : vector<4x16x8xf32> to vector<1x16x8xf32>
    %14 = vector.shape_cast %13 : vector<1x16x8xf32> to vector<16x8xf32>
    %cst_12 = arith.constant dense<0.000000e+00> : vector<16x256xf32>
    %15 = tpu.matmul %14, %10, %cst_12 {dimension_numbers = #tpu.dot_dimension_numbers<[1], [0], [0], [1], [0, 0, 1, 1], [], []>} : vector<16x8xf32>, vector<8x256xf32>, vector<16x256xf32> -> vector<16x256xf32>
    %16 = vector.extract_strided_slice %12 {offsets = [1, 0, 0], sizes = [1, 16, 8], strides = [1, 1, 1]} : vector<4x16x8xf32> to vector<1x16x8xf32>
    %17 = vector.shape_cast %16 : vector<1x16x8xf32> to vector<16x8xf32>
    %cst_13 = arith.constant dense<0.000000e+00> : vector<16x256xf32>
    %18 = tpu.matmul %17, %11, %cst_13 {dimension_numbers = #tpu.dot_dimension_numbers<[1], [0], [0], [1], [0, 0, 1, 1], [], []>} : vector<16x8xf32>, vector<8x256xf32>, vector<16x256xf32> -> vector<16x256xf32>
    %19 = arith.addf %15, %18 : vector<16x256xf32>
    %c0_14 = arith.constant 0 : index
    %c0_15 = arith.constant 0 : index
    %c0_16 = arith.constant 0 : index
    %c0_17 = arith.constant 0 : index
    %20 = vector.load %arg5[%c0_14, %c0_15, %c0_16, %c0_17] : memref<2x9x8x8xf32, #tpu.memory_space<vmem>>, vector<1x9x8x8xf32>
    %21 = vector.shape_cast %20 : vector<1x9x8x8xf32> to vector<9x8x8xf32>
    %c0_18 = arith.constant 0 : index
    %c0_19 = arith.constant 0 : index
    %c0_20 = arith.constant 0 : index
    %22 = vector.load %arg6[%c0_18, %c0_19, %c0_20] : memref<2x8x1xf32, #tpu.memory_space<vmem>>, vector<1x8x1xf32>
    %23 = vector.shape_cast %22 : vector<1x8x1xf32> to vector<8x1xf32>
    %c17_i32 = arith.constant 17 : i32
    %24 = tpu.dynamic_rotate %11 by %c17_i32 dim 1 : vector<8x256xf32>, i32 -> vector<8x256xf32>
    %25 = vector.extract_strided_slice %2 {offsets = [0, 0], sizes = [1, 256], strides = [1, 1]} : vector<9x256xf32> to vector<1x256xf32>
    %26 = vector.broadcast %25 : vector<1x256xf32> to vector<8x256xf32>
    %27 = arith.mulf %24, %26 : vector<8x256xf32>
    %28 = vector.extract_strided_slice %21 {offsets = [0, 0, 0], sizes = [1, 8, 8], strides = [1, 1, 1]} : vector<9x8x8xf32> to vector<1x8x8xf32>
    %29 = vector.shape_cast %28 : vector<1x8x8xf32> to vector<8x8xf32>
    %cst_21 = arith.constant dense<0.000000e+00> : vector<8x256xf32>
    %30 = tpu.matmul %29, %27, %cst_21 {dimension_numbers = #tpu.dot_dimension_numbers<[1], [0], [0], [1], [0, 0, 1, 1], [], []>} : vector<8x8xf32>, vector<8x256xf32>, vector<8x256xf32> -> vector<8x256xf32>
    %c16_i32 = arith.constant 16 : i32
    %31 = tpu.dynamic_rotate %11 by %c16_i32 dim 1 : vector<8x256xf32>, i32 -> vector<8x256xf32>
    %32 = vector.extract_strided_slice %2 {offsets = [1, 0], sizes = [1, 256], strides = [1, 1]} : vector<9x256xf32> to vector<1x256xf32>
    %33 = vector.broadcast %32 : vector<1x256xf32> to vector<8x256xf32>
    %34 = arith.mulf %31, %33 : vector<8x256xf32>
    %35 = vector.extract_strided_slice %21 {offsets = [1, 0, 0], sizes = [1, 8, 8], strides = [1, 1, 1]} : vector<9x8x8xf32> to vector<1x8x8xf32>
    %36 = vector.shape_cast %35 : vector<1x8x8xf32> to vector<8x8xf32>
    %cst_22 = arith.constant dense<0.000000e+00> : vector<8x256xf32>
    %37 = tpu.matmul %36, %34, %cst_22 {dimension_numbers = #tpu.dot_dimension_numbers<[1], [0], [0], [1], [0, 0, 1, 1], [], []>} : vector<8x8xf32>, vector<8x256xf32>, vector<8x256xf32> -> vector<8x256xf32>
    %38 = arith.addf %30, %37 : vector<8x256xf32>
    %c15_i32 = arith.constant 15 : i32
    %39 = tpu.dynamic_rotate %11 by %c15_i32 dim 1 : vector<8x256xf32>, i32 -> vector<8x256xf32>
    %40 = vector.extract_strided_slice %2 {offsets = [2, 0], sizes = [1, 256], strides = [1, 1]} : vector<9x256xf32> to vector<1x256xf32>
    %41 = vector.broadcast %40 : vector<1x256xf32> to vector<8x256xf32>
    %42 = arith.mulf %39, %41 : vector<8x256xf32>
    %43 = vector.extract_strided_slice %21 {offsets = [2, 0, 0], sizes = [1, 8, 8], strides = [1, 1, 1]} : vector<9x8x8xf32> to vector<1x8x8xf32>
    %44 = vector.shape_cast %43 : vector<1x8x8xf32> to vector<8x8xf32>
    %cst_23 = arith.constant dense<0.000000e+00> : vector<8x256xf32>
    %45 = tpu.matmul %44, %42, %cst_23 {dimension_numbers = #tpu.dot_dimension_numbers<[1], [0], [0], [1], [0, 0, 1, 1], [], []>} : vector<8x8xf32>, vector<8x256xf32>, vector<8x256xf32> -> vector<8x256xf32>
    %46 = arith.addf %38, %45 : vector<8x256xf32>
    %c1_i32 = arith.constant 1 : i32
    %47 = tpu.dynamic_rotate %11 by %c1_i32 dim 1 : vector<8x256xf32>, i32 -> vector<8x256xf32>
    %48 = vector.extract_strided_slice %2 {offsets = [3, 0], sizes = [1, 256], strides = [1, 1]} : vector<9x256xf32> to vector<1x256xf32>
    %49 = vector.broadcast %48 : vector<1x256xf32> to vector<8x256xf32>
    %50 = arith.mulf %47, %49 : vector<8x256xf32>
    %51 = vector.extract_strided_slice %21 {offsets = [3, 0, 0], sizes = [1, 8, 8], strides = [1, 1, 1]} : vector<9x8x8xf32> to vector<1x8x8xf32>
    %52 = vector.shape_cast %51 : vector<1x8x8xf32> to vector<8x8xf32>
    %cst_24 = arith.constant dense<0.000000e+00> : vector<8x256xf32>
    %53 = tpu.matmul %52, %50, %cst_24 {dimension_numbers = #tpu.dot_dimension_numbers<[1], [0], [0], [1], [0, 0, 1, 1], [], []>} : vector<8x8xf32>, vector<8x256xf32>, vector<8x256xf32> -> vector<8x256xf32>
    %54 = arith.addf %46, %53 : vector<8x256xf32>
    %55 = vector.extract_strided_slice %21 {offsets = [4, 0, 0], sizes = [1, 8, 8], strides = [1, 1, 1]} : vector<9x8x8xf32> to vector<1x8x8xf32>
    %56 = vector.shape_cast %55 : vector<1x8x8xf32> to vector<8x8xf32>
    %cst_25 = arith.constant dense<0.000000e+00> : vector<8x256xf32>
    %57 = tpu.matmul %56, %11, %cst_25 {dimension_numbers = #tpu.dot_dimension_numbers<[1], [0], [0], [1], [0, 0, 1, 1], [], []>} : vector<8x8xf32>, vector<8x256xf32>, vector<8x256xf32> -> vector<8x256xf32>
    %58 = arith.addf %54, %57 : vector<8x256xf32>
    %c255_i32 = arith.constant 255 : i32
    %59 = tpu.dynamic_rotate %11 by %c255_i32 dim 1 : vector<8x256xf32>, i32 -> vector<8x256xf32>
    %60 = vector.extract_strided_slice %2 {offsets = [5, 0], sizes = [1, 256], strides = [1, 1]} : vector<9x256xf32> to vector<1x256xf32>
    %61 = vector.broadcast %60 : vector<1x256xf32> to vector<8x256xf32>
    %62 = arith.mulf %59, %61 : vector<8x256xf32>
    %63 = vector.extract_strided_slice %21 {offsets = [5, 0, 0], sizes = [1, 8, 8], strides = [1, 1, 1]} : vector<9x8x8xf32> to vector<1x8x8xf32>
    %64 = vector.shape_cast %63 : vector<1x8x8xf32> to vector<8x8xf32>
    %cst_26 = arith.constant dense<0.000000e+00> : vector<8x256xf32>
    %65 = tpu.matmul %64, %62, %cst_26 {dimension_numbers = #tpu.dot_dimension_numbers<[1], [0], [0], [1], [0, 0, 1, 1], [], []>} : vector<8x8xf32>, vector<8x256xf32>, vector<8x256xf32> -> vector<8x256xf32>
    %66 = arith.addf %58, %65 : vector<8x256xf32>
    %c241_i32 = arith.constant 241 : i32
    %67 = tpu.dynamic_rotate %11 by %c241_i32 dim 1 : vector<8x256xf32>, i32 -> vector<8x256xf32>
    %68 = vector.extract_strided_slice %2 {offsets = [6, 0], sizes = [1, 256], strides = [1, 1]} : vector<9x256xf32> to vector<1x256xf32>
    %69 = vector.broadcast %68 : vector<1x256xf32> to vector<8x256xf32>
    %70 = arith.mulf %67, %69 : vector<8x256xf32>
    %71 = vector.extract_strided_slice %21 {offsets = [6, 0, 0], sizes = [1, 8, 8], strides = [1, 1, 1]} : vector<9x8x8xf32> to vector<1x8x8xf32>
    %72 = vector.shape_cast %71 : vector<1x8x8xf32> to vector<8x8xf32>
    %cst_27 = arith.constant dense<0.000000e+00> : vector<8x256xf32>
    %73 = tpu.matmul %72, %70, %cst_27 {dimension_numbers = #tpu.dot_dimension_numbers<[1], [0], [0], [1], [0, 0, 1, 1], [], []>} : vector<8x8xf32>, vector<8x256xf32>, vector<8x256xf32> -> vector<8x256xf32>
    %74 = arith.addf %66, %73 : vector<8x256xf32>
    %c240_i32 = arith.constant 240 : i32
    %75 = tpu.dynamic_rotate %11 by %c240_i32 dim 1 : vector<8x256xf32>, i32 -> vector<8x256xf32>
    %76 = vector.extract_strided_slice %2 {offsets = [7, 0], sizes = [1, 256], strides = [1, 1]} : vector<9x256xf32> to vector<1x256xf32>
    %77 = vector.broadcast %76 : vector<1x256xf32> to vector<8x256xf32>
    %78 = arith.mulf %75, %77 : vector<8x256xf32>
    %79 = vector.extract_strided_slice %21 {offsets = [7, 0, 0], sizes = [1, 8, 8], strides = [1, 1, 1]} : vector<9x8x8xf32> to vector<1x8x8xf32>
    %80 = vector.shape_cast %79 : vector<1x8x8xf32> to vector<8x8xf32>
    %cst_28 = arith.constant dense<0.000000e+00> : vector<8x256xf32>
    %81 = tpu.matmul %80, %78, %cst_28 {dimension_numbers = #tpu.dot_dimension_numbers<[1], [0], [0], [1], [0, 0, 1, 1], [], []>} : vector<8x8xf32>, vector<8x256xf32>, vector<8x256xf32> -> vector<8x256xf32>
    %82 = arith.addf %74, %81 : vector<8x256xf32>
    %c239_i32 = arith.constant 239 : i32
    %83 = tpu.dynamic_rotate %11 by %c239_i32 dim 1 : vector<8x256xf32>, i32 -> vector<8x256xf32>
    %84 = vector.extract_strided_slice %2 {offsets = [8, 0], sizes = [1, 256], strides = [1, 1]} : vector<9x256xf32> to vector<1x256xf32>
    %85 = vector.broadcast %84 : vector<1x256xf32> to vector<8x256xf32>
    %86 = arith.mulf %83, %85 : vector<8x256xf32>
    %87 = vector.extract_strided_slice %21 {offsets = [8, 0, 0], sizes = [1, 8, 8], strides = [1, 1, 1]} : vector<9x8x8xf32> to vector<1x8x8xf32>
    %88 = vector.shape_cast %87 : vector<1x8x8xf32> to vector<8x8xf32>
    %cst_29 = arith.constant dense<0.000000e+00> : vector<8x256xf32>
    %89 = tpu.matmul %88, %86, %cst_29 {dimension_numbers = #tpu.dot_dimension_numbers<[1], [0], [0], [1], [0, 0, 1, 1], [], []>} : vector<8x8xf32>, vector<8x256xf32>, vector<8x256xf32> -> vector<8x256xf32>
    %90 = arith.addf %82, %89 : vector<8x256xf32>
    %91 = vector.broadcast %23 : vector<8x1xf32> to vector<8x256xf32>
    %92 = arith.addf %90, %91 : vector<8x256xf32>
    %cst_30 = arith.constant 0.000000e+00 : f32
    %93 = vector.broadcast %cst_30 : f32 to vector<8x256xf32>
    %94 = arith.maximumf %92, %93 : vector<8x256xf32>
    %c0_31 = arith.constant 0 : index
    %c0_32 = arith.constant 0 : index
    %c0_33 = arith.constant 0 : index
    %c0_34 = arith.constant 0 : index
    %95 = vector.load %arg7[%c0_31, %c0_32, %c0_33, %c0_34] : memref<2x9x8x8xf32, #tpu.memory_space<vmem>>, vector<1x9x8x8xf32>
    %96 = vector.shape_cast %95 : vector<1x9x8x8xf32> to vector<9x8x8xf32>
    %c0_35 = arith.constant 0 : index
    %c0_36 = arith.constant 0 : index
    %c0_37 = arith.constant 0 : index
    %97 = vector.load %arg8[%c0_35, %c0_36, %c0_37] : memref<2x8x1xf32, #tpu.memory_space<vmem>>, vector<1x8x1xf32>
    %98 = vector.shape_cast %97 : vector<1x8x1xf32> to vector<8x1xf32>
    %c17_i32_38 = arith.constant 17 : i32
    %99 = tpu.dynamic_rotate %94 by %c17_i32_38 dim 1 : vector<8x256xf32>, i32 -> vector<8x256xf32>
    %100 = vector.extract_strided_slice %2 {offsets = [0, 0], sizes = [1, 256], strides = [1, 1]} : vector<9x256xf32> to vector<1x256xf32>
    %101 = vector.broadcast %100 : vector<1x256xf32> to vector<8x256xf32>
    %102 = arith.mulf %99, %101 : vector<8x256xf32>
    %103 = vector.extract_strided_slice %96 {offsets = [0, 0, 0], sizes = [1, 8, 8], strides = [1, 1, 1]} : vector<9x8x8xf32> to vector<1x8x8xf32>
    %104 = vector.shape_cast %103 : vector<1x8x8xf32> to vector<8x8xf32>
    %cst_39 = arith.constant dense<0.000000e+00> : vector<8x256xf32>
    %105 = tpu.matmul %104, %102, %cst_39 {dimension_numbers = #tpu.dot_dimension_numbers<[1], [0], [0], [1], [0, 0, 1, 1], [], []>} : vector<8x8xf32>, vector<8x256xf32>, vector<8x256xf32> -> vector<8x256xf32>
    %c16_i32_40 = arith.constant 16 : i32
    %106 = tpu.dynamic_rotate %94 by %c16_i32_40 dim 1 : vector<8x256xf32>, i32 -> vector<8x256xf32>
    %107 = vector.extract_strided_slice %2 {offsets = [1, 0], sizes = [1, 256], strides = [1, 1]} : vector<9x256xf32> to vector<1x256xf32>
    %108 = vector.broadcast %107 : vector<1x256xf32> to vector<8x256xf32>
    %109 = arith.mulf %106, %108 : vector<8x256xf32>
    %110 = vector.extract_strided_slice %96 {offsets = [1, 0, 0], sizes = [1, 8, 8], strides = [1, 1, 1]} : vector<9x8x8xf32> to vector<1x8x8xf32>
    %111 = vector.shape_cast %110 : vector<1x8x8xf32> to vector<8x8xf32>
    %cst_41 = arith.constant dense<0.000000e+00> : vector<8x256xf32>
    %112 = tpu.matmul %111, %109, %cst_41 {dimension_numbers = #tpu.dot_dimension_numbers<[1], [0], [0], [1], [0, 0, 1, 1], [], []>} : vector<8x8xf32>, vector<8x256xf32>, vector<8x256xf32> -> vector<8x256xf32>
    %113 = arith.addf %105, %112 : vector<8x256xf32>
    %c15_i32_42 = arith.constant 15 : i32
    %114 = tpu.dynamic_rotate %94 by %c15_i32_42 dim 1 : vector<8x256xf32>, i32 -> vector<8x256xf32>
    %115 = vector.extract_strided_slice %2 {offsets = [2, 0], sizes = [1, 256], strides = [1, 1]} : vector<9x256xf32> to vector<1x256xf32>
    %116 = vector.broadcast %115 : vector<1x256xf32> to vector<8x256xf32>
    %117 = arith.mulf %114, %116 : vector<8x256xf32>
    %118 = vector.extract_strided_slice %96 {offsets = [2, 0, 0], sizes = [1, 8, 8], strides = [1, 1, 1]} : vector<9x8x8xf32> to vector<1x8x8xf32>
    %119 = vector.shape_cast %118 : vector<1x8x8xf32> to vector<8x8xf32>
    %cst_43 = arith.constant dense<0.000000e+00> : vector<8x256xf32>
    %120 = tpu.matmul %119, %117, %cst_43 {dimension_numbers = #tpu.dot_dimension_numbers<[1], [0], [0], [1], [0, 0, 1, 1], [], []>} : vector<8x8xf32>, vector<8x256xf32>, vector<8x256xf32> -> vector<8x256xf32>
    %121 = arith.addf %113, %120 : vector<8x256xf32>
    %c1_i32_44 = arith.constant 1 : i32
    %122 = tpu.dynamic_rotate %94 by %c1_i32_44 dim 1 : vector<8x256xf32>, i32 -> vector<8x256xf32>
    %123 = vector.extract_strided_slice %2 {offsets = [3, 0], sizes = [1, 256], strides = [1, 1]} : vector<9x256xf32> to vector<1x256xf32>
    %124 = vector.broadcast %123 : vector<1x256xf32> to vector<8x256xf32>
    %125 = arith.mulf %122, %124 : vector<8x256xf32>
    %126 = vector.extract_strided_slice %96 {offsets = [3, 0, 0], sizes = [1, 8, 8], strides = [1, 1, 1]} : vector<9x8x8xf32> to vector<1x8x8xf32>
    %127 = vector.shape_cast %126 : vector<1x8x8xf32> to vector<8x8xf32>
    %cst_45 = arith.constant dense<0.000000e+00> : vector<8x256xf32>
    %128 = tpu.matmul %127, %125, %cst_45 {dimension_numbers = #tpu.dot_dimension_numbers<[1], [0], [0], [1], [0, 0, 1, 1], [], []>} : vector<8x8xf32>, vector<8x256xf32>, vector<8x256xf32> -> vector<8x256xf32>
    %129 = arith.addf %121, %128 : vector<8x256xf32>
    %130 = vector.extract_strided_slice %96 {offsets = [4, 0, 0], sizes = [1, 8, 8], strides = [1, 1, 1]} : vector<9x8x8xf32> to vector<1x8x8xf32>
    %131 = vector.shape_cast %130 : vector<1x8x8xf32> to vector<8x8xf32>
    %cst_46 = arith.constant dense<0.000000e+00> : vector<8x256xf32>
    %132 = tpu.matmul %131, %94, %cst_46 {dimension_numbers = #tpu.dot_dimension_numbers<[1], [0], [0], [1], [0, 0, 1, 1], [], []>} : vector<8x8xf32>, vector<8x256xf32>, vector<8x256xf32> -> vector<8x256xf32>
    %133 = arith.addf %129, %132 : vector<8x256xf32>
    %c255_i32_47 = arith.constant 255 : i32
    %134 = tpu.dynamic_rotate %94 by %c255_i32_47 dim 1 : vector<8x256xf32>, i32 -> vector<8x256xf32>
    %135 = vector.extract_strided_slice %2 {offsets = [5, 0], sizes = [1, 256], strides = [1, 1]} : vector<9x256xf32> to vector<1x256xf32>
    %136 = vector.broadcast %135 : vector<1x256xf32> to vector<8x256xf32>
    %137 = arith.mulf %134, %136 : vector<8x256xf32>
    %138 = vector.extract_strided_slice %96 {offsets = [5, 0, 0], sizes = [1, 8, 8], strides = [1, 1, 1]} : vector<9x8x8xf32> to vector<1x8x8xf32>
    %139 = vector.shape_cast %138 : vector<1x8x8xf32> to vector<8x8xf32>
    %cst_48 = arith.constant dense<0.000000e+00> : vector<8x256xf32>
    %140 = tpu.matmul %139, %137, %cst_48 {dimension_numbers = #tpu.dot_dimension_numbers<[1], [0], [0], [1], [0, 0, 1, 1], [], []>} : vector<8x8xf32>, vector<8x256xf32>, vector<8x256xf32> -> vector<8x256xf32>
    %141 = arith.addf %133, %140 : vector<8x256xf32>
    %c241_i32_49 = arith.constant 241 : i32
    %142 = tpu.dynamic_rotate %94 by %c241_i32_49 dim 1 : vector<8x256xf32>, i32 -> vector<8x256xf32>
    %143 = vector.extract_strided_slice %2 {offsets = [6, 0], sizes = [1, 256], strides = [1, 1]} : vector<9x256xf32> to vector<1x256xf32>
    %144 = vector.broadcast %143 : vector<1x256xf32> to vector<8x256xf32>
    %145 = arith.mulf %142, %144 : vector<8x256xf32>
    %146 = vector.extract_strided_slice %96 {offsets = [6, 0, 0], sizes = [1, 8, 8], strides = [1, 1, 1]} : vector<9x8x8xf32> to vector<1x8x8xf32>
    %147 = vector.shape_cast %146 : vector<1x8x8xf32> to vector<8x8xf32>
    %cst_50 = arith.constant dense<0.000000e+00> : vector<8x256xf32>
    %148 = tpu.matmul %147, %145, %cst_50 {dimension_numbers = #tpu.dot_dimension_numbers<[1], [0], [0], [1], [0, 0, 1, 1], [], []>} : vector<8x8xf32>, vector<8x256xf32>, vector<8x256xf32> -> vector<8x256xf32>
    %149 = arith.addf %141, %148 : vector<8x256xf32>
    %c240_i32_51 = arith.constant 240 : i32
    %150 = tpu.dynamic_rotate %94 by %c240_i32_51 dim 1 : vector<8x256xf32>, i32 -> vector<8x256xf32>
    %151 = vector.extract_strided_slice %2 {offsets = [7, 0], sizes = [1, 256], strides = [1, 1]} : vector<9x256xf32> to vector<1x256xf32>
    %152 = vector.broadcast %151 : vector<1x256xf32> to vector<8x256xf32>
    %153 = arith.mulf %150, %152 : vector<8x256xf32>
    %154 = vector.extract_strided_slice %96 {offsets = [7, 0, 0], sizes = [1, 8, 8], strides = [1, 1, 1]} : vector<9x8x8xf32> to vector<1x8x8xf32>
    %155 = vector.shape_cast %154 : vector<1x8x8xf32> to vector<8x8xf32>
    %cst_52 = arith.constant dense<0.000000e+00> : vector<8x256xf32>
    %156 = tpu.matmul %155, %153, %cst_52 {dimension_numbers = #tpu.dot_dimension_numbers<[1], [0], [0], [1], [0, 0, 1, 1], [], []>} : vector<8x8xf32>, vector<8x256xf32>, vector<8x256xf32> -> vector<8x256xf32>
    %157 = arith.addf %149, %156 : vector<8x256xf32>
    %c239_i32_53 = arith.constant 239 : i32
    %158 = tpu.dynamic_rotate %94 by %c239_i32_53 dim 1 : vector<8x256xf32>, i32 -> vector<8x256xf32>
    %159 = vector.extract_strided_slice %2 {offsets = [8, 0], sizes = [1, 256], strides = [1, 1]} : vector<9x256xf32> to vector<1x256xf32>
    %160 = vector.broadcast %159 : vector<1x256xf32> to vector<8x256xf32>
    %161 = arith.mulf %158, %160 : vector<8x256xf32>
    %162 = vector.extract_strided_slice %96 {offsets = [8, 0, 0], sizes = [1, 8, 8], strides = [1, 1, 1]} : vector<9x8x8xf32> to vector<1x8x8xf32>
    %163 = vector.shape_cast %162 : vector<1x8x8xf32> to vector<8x8xf32>
    %cst_54 = arith.constant dense<0.000000e+00> : vector<8x256xf32>
    %164 = tpu.matmul %163, %161, %cst_54 {dimension_numbers = #tpu.dot_dimension_numbers<[1], [0], [0], [1], [0, 0, 1, 1], [], []>} : vector<8x8xf32>, vector<8x256xf32>, vector<8x256xf32> -> vector<8x256xf32>
    %165 = arith.addf %157, %164 : vector<8x256xf32>
    %166 = vector.broadcast %98 : vector<8x1xf32> to vector<8x256xf32>
    %167 = arith.addf %165, %166 : vector<8x256xf32>
    %cst_55 = arith.constant 0.000000e+00 : f32
    %168 = vector.broadcast %cst_55 : f32 to vector<8x256xf32>
    %169 = arith.maximumf %167, %168 : vector<8x256xf32>
    %170 = vector.extract_strided_slice %12 {offsets = [2, 0, 0], sizes = [1, 16, 8], strides = [1, 1, 1]} : vector<4x16x8xf32> to vector<1x16x8xf32>
    %171 = vector.shape_cast %170 : vector<1x16x8xf32> to vector<16x8xf32>
    %cst_56 = arith.constant dense<0.000000e+00> : vector<16x256xf32>
    %172 = tpu.matmul %171, %169, %cst_56 {dimension_numbers = #tpu.dot_dimension_numbers<[1], [0], [0], [1], [0, 0, 1, 1], [], []>} : vector<16x8xf32>, vector<8x256xf32>, vector<16x256xf32> -> vector<16x256xf32>
    %173 = arith.addf %19, %172 : vector<16x256xf32>
    %c1 = arith.constant 1 : index
    %c0_57 = arith.constant 0 : index
    %c0_58 = arith.constant 0 : index
    %c0_59 = arith.constant 0 : index
    %174 = vector.load %arg5[%c1, %c0_57, %c0_58, %c0_59] : memref<2x9x8x8xf32, #tpu.memory_space<vmem>>, vector<1x9x8x8xf32>
    %175 = vector.shape_cast %174 : vector<1x9x8x8xf32> to vector<9x8x8xf32>
    %c1_60 = arith.constant 1 : index
    %c0_61 = arith.constant 0 : index
    %c0_62 = arith.constant 0 : index
    %176 = vector.load %arg6[%c1_60, %c0_61, %c0_62] : memref<2x8x1xf32, #tpu.memory_space<vmem>>, vector<1x8x1xf32>
    %177 = vector.shape_cast %176 : vector<1x8x1xf32> to vector<8x1xf32>
    %c17_i32_63 = arith.constant 17 : i32
    %178 = tpu.dynamic_rotate %169 by %c17_i32_63 dim 1 : vector<8x256xf32>, i32 -> vector<8x256xf32>
    %179 = vector.extract_strided_slice %2 {offsets = [0, 0], sizes = [1, 256], strides = [1, 1]} : vector<9x256xf32> to vector<1x256xf32>
    %180 = vector.broadcast %179 : vector<1x256xf32> to vector<8x256xf32>
    %181 = arith.mulf %178, %180 : vector<8x256xf32>
    %182 = vector.extract_strided_slice %175 {offsets = [0, 0, 0], sizes = [1, 8, 8], strides = [1, 1, 1]} : vector<9x8x8xf32> to vector<1x8x8xf32>
    %183 = vector.shape_cast %182 : vector<1x8x8xf32> to vector<8x8xf32>
    %cst_64 = arith.constant dense<0.000000e+00> : vector<8x256xf32>
    %184 = tpu.matmul %183, %181, %cst_64 {dimension_numbers = #tpu.dot_dimension_numbers<[1], [0], [0], [1], [0, 0, 1, 1], [], []>} : vector<8x8xf32>, vector<8x256xf32>, vector<8x256xf32> -> vector<8x256xf32>
    %c16_i32_65 = arith.constant 16 : i32
    %185 = tpu.dynamic_rotate %169 by %c16_i32_65 dim 1 : vector<8x256xf32>, i32 -> vector<8x256xf32>
    %186 = vector.extract_strided_slice %2 {offsets = [1, 0], sizes = [1, 256], strides = [1, 1]} : vector<9x256xf32> to vector<1x256xf32>
    %187 = vector.broadcast %186 : vector<1x256xf32> to vector<8x256xf32>
    %188 = arith.mulf %185, %187 : vector<8x256xf32>
    %189 = vector.extract_strided_slice %175 {offsets = [1, 0, 0], sizes = [1, 8, 8], strides = [1, 1, 1]} : vector<9x8x8xf32> to vector<1x8x8xf32>
    %190 = vector.shape_cast %189 : vector<1x8x8xf32> to vector<8x8xf32>
    %cst_66 = arith.constant dense<0.000000e+00> : vector<8x256xf32>
    %191 = tpu.matmul %190, %188, %cst_66 {dimension_numbers = #tpu.dot_dimension_numbers<[1], [0], [0], [1], [0, 0, 1, 1], [], []>} : vector<8x8xf32>, vector<8x256xf32>, vector<8x256xf32> -> vector<8x256xf32>
    %192 = arith.addf %184, %191 : vector<8x256xf32>
    %c15_i32_67 = arith.constant 15 : i32
    %193 = tpu.dynamic_rotate %169 by %c15_i32_67 dim 1 : vector<8x256xf32>, i32 -> vector<8x256xf32>
    %194 = vector.extract_strided_slice %2 {offsets = [2, 0], sizes = [1, 256], strides = [1, 1]} : vector<9x256xf32> to vector<1x256xf32>
    %195 = vector.broadcast %194 : vector<1x256xf32> to vector<8x256xf32>
    %196 = arith.mulf %193, %195 : vector<8x256xf32>
    %197 = vector.extract_strided_slice %175 {offsets = [2, 0, 0], sizes = [1, 8, 8], strides = [1, 1, 1]} : vector<9x8x8xf32> to vector<1x8x8xf32>
    %198 = vector.shape_cast %197 : vector<1x8x8xf32> to vector<8x8xf32>
    %cst_68 = arith.constant dense<0.000000e+00> : vector<8x256xf32>
    %199 = tpu.matmul %198, %196, %cst_68 {dimension_numbers = #tpu.dot_dimension_numbers<[1], [0], [0], [1], [0, 0, 1, 1], [], []>} : vector<8x8xf32>, vector<8x256xf32>, vector<8x256xf32> -> vector<8x256xf32>
    %200 = arith.addf %192, %199 : vector<8x256xf32>
    %c1_i32_69 = arith.constant 1 : i32
    %201 = tpu.dynamic_rotate %169 by %c1_i32_69 dim 1 : vector<8x256xf32>, i32 -> vector<8x256xf32>
    %202 = vector.extract_strided_slice %2 {offsets = [3, 0], sizes = [1, 256], strides = [1, 1]} : vector<9x256xf32> to vector<1x256xf32>
    %203 = vector.broadcast %202 : vector<1x256xf32> to vector<8x256xf32>
    %204 = arith.mulf %201, %203 : vector<8x256xf32>
    %205 = vector.extract_strided_slice %175 {offsets = [3, 0, 0], sizes = [1, 8, 8], strides = [1, 1, 1]} : vector<9x8x8xf32> to vector<1x8x8xf32>
    %206 = vector.shape_cast %205 : vector<1x8x8xf32> to vector<8x8xf32>
    %cst_70 = arith.constant dense<0.000000e+00> : vector<8x256xf32>
    %207 = tpu.matmul %206, %204, %cst_70 {dimension_numbers = #tpu.dot_dimension_numbers<[1], [0], [0], [1], [0, 0, 1, 1], [], []>} : vector<8x8xf32>, vector<8x256xf32>, vector<8x256xf32> -> vector<8x256xf32>
    %208 = arith.addf %200, %207 : vector<8x256xf32>
    %209 = vector.extract_strided_slice %175 {offsets = [4, 0, 0], sizes = [1, 8, 8], strides = [1, 1, 1]} : vector<9x8x8xf32> to vector<1x8x8xf32>
    %210 = vector.shape_cast %209 : vector<1x8x8xf32> to vector<8x8xf32>
    %cst_71 = arith.constant dense<0.000000e+00> : vector<8x256xf32>
    %211 = tpu.matmul %210, %169, %cst_71 {dimension_numbers = #tpu.dot_dimension_numbers<[1], [0], [0], [1], [0, 0, 1, 1], [], []>} : vector<8x8xf32>, vector<8x256xf32>, vector<8x256xf32> -> vector<8x256xf32>
    %212 = arith.addf %208, %211 : vector<8x256xf32>
    %c255_i32_72 = arith.constant 255 : i32
    %213 = tpu.dynamic_rotate %169 by %c255_i32_72 dim 1 : vector<8x256xf32>, i32 -> vector<8x256xf32>
    %214 = vector.extract_strided_slice %2 {offsets = [5, 0], sizes = [1, 256], strides = [1, 1]} : vector<9x256xf32> to vector<1x256xf32>
    %215 = vector.broadcast %214 : vector<1x256xf32> to vector<8x256xf32>
    %216 = arith.mulf %213, %215 : vector<8x256xf32>
    %217 = vector.extract_strided_slice %175 {offsets = [5, 0, 0], sizes = [1, 8, 8], strides = [1, 1, 1]} : vector<9x8x8xf32> to vector<1x8x8xf32>
    %218 = vector.shape_cast %217 : vector<1x8x8xf32> to vector<8x8xf32>
    %cst_73 = arith.constant dense<0.000000e+00> : vector<8x256xf32>
    %219 = tpu.matmul %218, %216, %cst_73 {dimension_numbers = #tpu.dot_dimension_numbers<[1], [0], [0], [1], [0, 0, 1, 1], [], []>} : vector<8x8xf32>, vector<8x256xf32>, vector<8x256xf32> -> vector<8x256xf32>
    %220 = arith.addf %212, %219 : vector<8x256xf32>
    %c241_i32_74 = arith.constant 241 : i32
    %221 = tpu.dynamic_rotate %169 by %c241_i32_74 dim 1 : vector<8x256xf32>, i32 -> vector<8x256xf32>
    %222 = vector.extract_strided_slice %2 {offsets = [6, 0], sizes = [1, 256], strides = [1, 1]} : vector<9x256xf32> to vector<1x256xf32>
    %223 = vector.broadcast %222 : vector<1x256xf32> to vector<8x256xf32>
    %224 = arith.mulf %221, %223 : vector<8x256xf32>
    %225 = vector.extract_strided_slice %175 {offsets = [6, 0, 0], sizes = [1, 8, 8], strides = [1, 1, 1]} : vector<9x8x8xf32> to vector<1x8x8xf32>
    %226 = vector.shape_cast %225 : vector<1x8x8xf32> to vector<8x8xf32>
    %cst_75 = arith.constant dense<0.000000e+00> : vector<8x256xf32>
    %227 = tpu.matmul %226, %224, %cst_75 {dimension_numbers = #tpu.dot_dimension_numbers<[1], [0], [0], [1], [0, 0, 1, 1], [], []>} : vector<8x8xf32>, vector<8x256xf32>, vector<8x256xf32> -> vector<8x256xf32>
    %228 = arith.addf %220, %227 : vector<8x256xf32>
    %c240_i32_76 = arith.constant 240 : i32
    %229 = tpu.dynamic_rotate %169 by %c240_i32_76 dim 1 : vector<8x256xf32>, i32 -> vector<8x256xf32>
    %230 = vector.extract_strided_slice %2 {offsets = [7, 0], sizes = [1, 256], strides = [1, 1]} : vector<9x256xf32> to vector<1x256xf32>
    %231 = vector.broadcast %230 : vector<1x256xf32> to vector<8x256xf32>
    %232 = arith.mulf %229, %231 : vector<8x256xf32>
    %233 = vector.extract_strided_slice %175 {offsets = [7, 0, 0], sizes = [1, 8, 8], strides = [1, 1, 1]} : vector<9x8x8xf32> to vector<1x8x8xf32>
    %234 = vector.shape_cast %233 : vector<1x8x8xf32> to vector<8x8xf32>
    %cst_77 = arith.constant dense<0.000000e+00> : vector<8x256xf32>
    %235 = tpu.matmul %234, %232, %cst_77 {dimension_numbers = #tpu.dot_dimension_numbers<[1], [0], [0], [1], [0, 0, 1, 1], [], []>} : vector<8x8xf32>, vector<8x256xf32>, vector<8x256xf32> -> vector<8x256xf32>
    %236 = arith.addf %228, %235 : vector<8x256xf32>
    %c239_i32_78 = arith.constant 239 : i32
    %237 = tpu.dynamic_rotate %169 by %c239_i32_78 dim 1 : vector<8x256xf32>, i32 -> vector<8x256xf32>
    %238 = vector.extract_strided_slice %2 {offsets = [8, 0], sizes = [1, 256], strides = [1, 1]} : vector<9x256xf32> to vector<1x256xf32>
    %239 = vector.broadcast %238 : vector<1x256xf32> to vector<8x256xf32>
    %240 = arith.mulf %237, %239 : vector<8x256xf32>
    %241 = vector.extract_strided_slice %175 {offsets = [8, 0, 0], sizes = [1, 8, 8], strides = [1, 1, 1]} : vector<9x8x8xf32> to vector<1x8x8xf32>
    %242 = vector.shape_cast %241 : vector<1x8x8xf32> to vector<8x8xf32>
    %cst_79 = arith.constant dense<0.000000e+00> : vector<8x256xf32>
    %243 = tpu.matmul %242, %240, %cst_79 {dimension_numbers = #tpu.dot_dimension_numbers<[1], [0], [0], [1], [0, 0, 1, 1], [], []>} : vector<8x8xf32>, vector<8x256xf32>, vector<8x256xf32> -> vector<8x256xf32>
    %244 = arith.addf %236, %243 : vector<8x256xf32>
    %245 = vector.broadcast %177 : vector<8x1xf32> to vector<8x256xf32>
    %246 = arith.addf %244, %245 : vector<8x256xf32>
    %cst_80 = arith.constant 0.000000e+00 : f32
    %247 = vector.broadcast %cst_80 : f32 to vector<8x256xf32>
    %248 = arith.maximumf %246, %247 : vector<8x256xf32>
    %c1_81 = arith.constant 1 : index
    %c0_82 = arith.constant 0 : index
    %c0_83 = arith.constant 0 : index
    %c0_84 = arith.constant 0 : index
    %249 = vector.load %arg7[%c1_81, %c0_82, %c0_83, %c0_84] : memref<2x9x8x8xf32, #tpu.memory_space<vmem>>, vector<1x9x8x8xf32>
    %250 = vector.shape_cast %249 : vector<1x9x8x8xf32> to vector<9x8x8xf32>
    %c1_85 = arith.constant 1 : index
    %c0_86 = arith.constant 0 : index
    %c0_87 = arith.constant 0 : index
    %251 = vector.load %arg8[%c1_85, %c0_86, %c0_87] : memref<2x8x1xf32, #tpu.memory_space<vmem>>, vector<1x8x1xf32>
    %252 = vector.shape_cast %251 : vector<1x8x1xf32> to vector<8x1xf32>
    %c17_i32_88 = arith.constant 17 : i32
    %253 = tpu.dynamic_rotate %248 by %c17_i32_88 dim 1 : vector<8x256xf32>, i32 -> vector<8x256xf32>
    %254 = vector.extract_strided_slice %2 {offsets = [0, 0], sizes = [1, 256], strides = [1, 1]} : vector<9x256xf32> to vector<1x256xf32>
    %255 = vector.broadcast %254 : vector<1x256xf32> to vector<8x256xf32>
    %256 = arith.mulf %253, %255 : vector<8x256xf32>
    %257 = vector.extract_strided_slice %250 {offsets = [0, 0, 0], sizes = [1, 8, 8], strides = [1, 1, 1]} : vector<9x8x8xf32> to vector<1x8x8xf32>
    %258 = vector.shape_cast %257 : vector<1x8x8xf32> to vector<8x8xf32>
    %cst_89 = arith.constant dense<0.000000e+00> : vector<8x256xf32>
    %259 = tpu.matmul %258, %256, %cst_89 {dimension_numbers = #tpu.dot_dimension_numbers<[1], [0], [0], [1], [0, 0, 1, 1], [], []>} : vector<8x8xf32>, vector<8x256xf32>, vector<8x256xf32> -> vector<8x256xf32>
    %c16_i32_90 = arith.constant 16 : i32
    %260 = tpu.dynamic_rotate %248 by %c16_i32_90 dim 1 : vector<8x256xf32>, i32 -> vector<8x256xf32>
    %261 = vector.extract_strided_slice %2 {offsets = [1, 0], sizes = [1, 256], strides = [1, 1]} : vector<9x256xf32> to vector<1x256xf32>
    %262 = vector.broadcast %261 : vector<1x256xf32> to vector<8x256xf32>
    %263 = arith.mulf %260, %262 : vector<8x256xf32>
    %264 = vector.extract_strided_slice %250 {offsets = [1, 0, 0], sizes = [1, 8, 8], strides = [1, 1, 1]} : vector<9x8x8xf32> to vector<1x8x8xf32>
    %265 = vector.shape_cast %264 : vector<1x8x8xf32> to vector<8x8xf32>
    %cst_91 = arith.constant dense<0.000000e+00> : vector<8x256xf32>
    %266 = tpu.matmul %265, %263, %cst_91 {dimension_numbers = #tpu.dot_dimension_numbers<[1], [0], [0], [1], [0, 0, 1, 1], [], []>} : vector<8x8xf32>, vector<8x256xf32>, vector<8x256xf32> -> vector<8x256xf32>
    %267 = arith.addf %259, %266 : vector<8x256xf32>
    %c15_i32_92 = arith.constant 15 : i32
    %268 = tpu.dynamic_rotate %248 by %c15_i32_92 dim 1 : vector<8x256xf32>, i32 -> vector<8x256xf32>
    %269 = vector.extract_strided_slice %2 {offsets = [2, 0], sizes = [1, 256], strides = [1, 1]} : vector<9x256xf32> to vector<1x256xf32>
    %270 = vector.broadcast %269 : vector<1x256xf32> to vector<8x256xf32>
    %271 = arith.mulf %268, %270 : vector<8x256xf32>
    %272 = vector.extract_strided_slice %250 {offsets = [2, 0, 0], sizes = [1, 8, 8], strides = [1, 1, 1]} : vector<9x8x8xf32> to vector<1x8x8xf32>
    %273 = vector.shape_cast %272 : vector<1x8x8xf32> to vector<8x8xf32>
    %cst_93 = arith.constant dense<0.000000e+00> : vector<8x256xf32>
    %274 = tpu.matmul %273, %271, %cst_93 {dimension_numbers = #tpu.dot_dimension_numbers<[1], [0], [0], [1], [0, 0, 1, 1], [], []>} : vector<8x8xf32>, vector<8x256xf32>, vector<8x256xf32> -> vector<8x256xf32>
    %275 = arith.addf %267, %274 : vector<8x256xf32>
    %c1_i32_94 = arith.constant 1 : i32
    %276 = tpu.dynamic_rotate %248 by %c1_i32_94 dim 1 : vector<8x256xf32>, i32 -> vector<8x256xf32>
    %277 = vector.extract_strided_slice %2 {offsets = [3, 0], sizes = [1, 256], strides = [1, 1]} : vector<9x256xf32> to vector<1x256xf32>
    %278 = vector.broadcast %277 : vector<1x256xf32> to vector<8x256xf32>
    %279 = arith.mulf %276, %278 : vector<8x256xf32>
    %280 = vector.extract_strided_slice %250 {offsets = [3, 0, 0], sizes = [1, 8, 8], strides = [1, 1, 1]} : vector<9x8x8xf32> to vector<1x8x8xf32>
    %281 = vector.shape_cast %280 : vector<1x8x8xf32> to vector<8x8xf32>
    %cst_95 = arith.constant dense<0.000000e+00> : vector<8x256xf32>
    %282 = tpu.matmul %281, %279, %cst_95 {dimension_numbers = #tpu.dot_dimension_numbers<[1], [0], [0], [1], [0, 0, 1, 1], [], []>} : vector<8x8xf32>, vector<8x256xf32>, vector<8x256xf32> -> vector<8x256xf32>
    %283 = arith.addf %275, %282 : vector<8x256xf32>
    %284 = vector.extract_strided_slice %250 {offsets = [4, 0, 0], sizes = [1, 8, 8], strides = [1, 1, 1]} : vector<9x8x8xf32> to vector<1x8x8xf32>
    %285 = vector.shape_cast %284 : vector<1x8x8xf32> to vector<8x8xf32>
    %cst_96 = arith.constant dense<0.000000e+00> : vector<8x256xf32>
    %286 = tpu.matmul %285, %248, %cst_96 {dimension_numbers = #tpu.dot_dimension_numbers<[1], [0], [0], [1], [0, 0, 1, 1], [], []>} : vector<8x8xf32>, vector<8x256xf32>, vector<8x256xf32> -> vector<8x256xf32>
    %287 = arith.addf %283, %286 : vector<8x256xf32>
    %c255_i32_97 = arith.constant 255 : i32
    %288 = tpu.dynamic_rotate %248 by %c255_i32_97 dim 1 : vector<8x256xf32>, i32 -> vector<8x256xf32>
    %289 = vector.extract_strided_slice %2 {offsets = [5, 0], sizes = [1, 256], strides = [1, 1]} : vector<9x256xf32> to vector<1x256xf32>
    %290 = vector.broadcast %289 : vector<1x256xf32> to vector<8x256xf32>
    %291 = arith.mulf %288, %290 : vector<8x256xf32>
    %292 = vector.extract_strided_slice %250 {offsets = [5, 0, 0], sizes = [1, 8, 8], strides = [1, 1, 1]} : vector<9x8x8xf32> to vector<1x8x8xf32>
    %293 = vector.shape_cast %292 : vector<1x8x8xf32> to vector<8x8xf32>
    %cst_98 = arith.constant dense<0.000000e+00> : vector<8x256xf32>
    %294 = tpu.matmul %293, %291, %cst_98 {dimension_numbers = #tpu.dot_dimension_numbers<[1], [0], [0], [1], [0, 0, 1, 1], [], []>} : vector<8x8xf32>, vector<8x256xf32>, vector<8x256xf32> -> vector<8x256xf32>
    %295 = arith.addf %287, %294 : vector<8x256xf32>
    %c241_i32_99 = arith.constant 241 : i32
    %296 = tpu.dynamic_rotate %248 by %c241_i32_99 dim 1 : vector<8x256xf32>, i32 -> vector<8x256xf32>
    %297 = vector.extract_strided_slice %2 {offsets = [6, 0], sizes = [1, 256], strides = [1, 1]} : vector<9x256xf32> to vector<1x256xf32>
    %298 = vector.broadcast %297 : vector<1x256xf32> to vector<8x256xf32>
    %299 = arith.mulf %296, %298 : vector<8x256xf32>
    %300 = vector.extract_strided_slice %250 {offsets = [6, 0, 0], sizes = [1, 8, 8], strides = [1, 1, 1]} : vector<9x8x8xf32> to vector<1x8x8xf32>
    %301 = vector.shape_cast %300 : vector<1x8x8xf32> to vector<8x8xf32>
    %cst_100 = arith.constant dense<0.000000e+00> : vector<8x256xf32>
    %302 = tpu.matmul %301, %299, %cst_100 {dimension_numbers = #tpu.dot_dimension_numbers<[1], [0], [0], [1], [0, 0, 1, 1], [], []>} : vector<8x8xf32>, vector<8x256xf32>, vector<8x256xf32> -> vector<8x256xf32>
    %303 = arith.addf %295, %302 : vector<8x256xf32>
    %c240_i32_101 = arith.constant 240 : i32
    %304 = tpu.dynamic_rotate %248 by %c240_i32_101 dim 1 : vector<8x256xf32>, i32 -> vector<8x256xf32>
    %305 = vector.extract_strided_slice %2 {offsets = [7, 0], sizes = [1, 256], strides = [1, 1]} : vector<9x256xf32> to vector<1x256xf32>
    %306 = vector.broadcast %305 : vector<1x256xf32> to vector<8x256xf32>
    %307 = arith.mulf %304, %306 : vector<8x256xf32>
    %308 = vector.extract_strided_slice %250 {offsets = [7, 0, 0], sizes = [1, 8, 8], strides = [1, 1, 1]} : vector<9x8x8xf32> to vector<1x8x8xf32>
    %309 = vector.shape_cast %308 : vector<1x8x8xf32> to vector<8x8xf32>
    %cst_102 = arith.constant dense<0.000000e+00> : vector<8x256xf32>
    %310 = tpu.matmul %309, %307, %cst_102 {dimension_numbers = #tpu.dot_dimension_numbers<[1], [0], [0], [1], [0, 0, 1, 1], [], []>} : vector<8x8xf32>, vector<8x256xf32>, vector<8x256xf32> -> vector<8x256xf32>
    %311 = arith.addf %303, %310 : vector<8x256xf32>
    %c239_i32_103 = arith.constant 239 : i32
    %312 = tpu.dynamic_rotate %248 by %c239_i32_103 dim 1 : vector<8x256xf32>, i32 -> vector<8x256xf32>
    %313 = vector.extract_strided_slice %2 {offsets = [8, 0], sizes = [1, 256], strides = [1, 1]} : vector<9x256xf32> to vector<1x256xf32>
    %314 = vector.broadcast %313 : vector<1x256xf32> to vector<8x256xf32>
    %315 = arith.mulf %312, %314 : vector<8x256xf32>
    %316 = vector.extract_strided_slice %250 {offsets = [8, 0, 0], sizes = [1, 8, 8], strides = [1, 1, 1]} : vector<9x8x8xf32> to vector<1x8x8xf32>
    %317 = vector.shape_cast %316 : vector<1x8x8xf32> to vector<8x8xf32>
    %cst_104 = arith.constant dense<0.000000e+00> : vector<8x256xf32>
    %318 = tpu.matmul %317, %315, %cst_104 {dimension_numbers = #tpu.dot_dimension_numbers<[1], [0], [0], [1], [0, 0, 1, 1], [], []>} : vector<8x8xf32>, vector<8x256xf32>, vector<8x256xf32> -> vector<8x256xf32>
    %319 = arith.addf %311, %318 : vector<8x256xf32>
    %320 = vector.broadcast %252 : vector<8x1xf32> to vector<8x256xf32>
    %321 = arith.addf %319, %320 : vector<8x256xf32>
    %cst_105 = arith.constant 0.000000e+00 : f32
    %322 = vector.broadcast %cst_105 : f32 to vector<8x256xf32>
    %323 = arith.maximumf %321, %322 : vector<8x256xf32>
    %324 = vector.extract_strided_slice %12 {offsets = [3, 0, 0], sizes = [1, 16, 8], strides = [1, 1, 1]} : vector<4x16x8xf32> to vector<1x16x8xf32>
    %325 = vector.shape_cast %324 : vector<1x16x8xf32> to vector<16x8xf32>
    %cst_106 = arith.constant dense<0.000000e+00> : vector<16x256xf32>
    %326 = tpu.matmul %325, %323, %cst_106 {dimension_numbers = #tpu.dot_dimension_numbers<[1], [0], [0], [1], [0, 0, 1, 1], [], []>} : vector<16x8xf32>, vector<8x256xf32>, vector<16x256xf32> -> vector<16x256xf32>
    %327 = arith.addf %173, %326 : vector<16x256xf32>
    %c0_107 = arith.constant 0 : index
    %c0_108 = arith.constant 0 : index
    %328 = vector.load %arg10[%c0_107, %c0_108] : memref<16x1xf32, #tpu.memory_space<vmem>>, vector<16x1xf32>
    %329 = vector.broadcast %328 : vector<16x1xf32> to vector<16x256xf32>
    %330 = arith.addf %327, %329 : vector<16x256xf32>
    %cst_109 = arith.constant 0.000000e+00 : f32
    %331 = vector.broadcast %cst_109 : f32 to vector<16x256xf32>
    %332 = arith.maximumf %330, %331 : vector<16x256xf32>
    %c0_110 = arith.constant 0 : index
    %c0_111 = arith.constant 0 : index
    %c0_112 = arith.constant 0 : index
    %333 = vector.load %arg11[%c0_110, %c0_111, %c0_112] : memref<1x16x256xf32, #tpu.memory_space<vmem>>, vector<1x16x256xf32>
    %334 = vector.shape_cast %333 : vector<1x16x256xf32> to vector<16x256xf32>
    %335 = vector.shape_cast %332 : vector<16x256xf32> to vector<1x16x256xf32>
    tpu.vector_store %arg11[%c0_110, %c0_111, %c0_112], %335 {strides = array<i32>} : memref<1x16x256xf32, #tpu.memory_space<vmem>>, vector<1x16x256xf32>,
    return
  }
  func.func @transform_0(%arg0: i32) -> (i32, i32, i32) {
    %c0_i32 = arith.constant 0 : i32
    %c0_i32_0 = arith.constant 0 : i32
    %c0_i32_1 = arith.constant 0 : i32
    return %arg0, %c0_i32, %c0_i32_0 : i32, i32, i32
  }
  func.func @transform_1(%arg0: i32) -> (i32, i32) {
    %c0_i32 = arith.constant 0 : i32
    %c0_i32_0 = arith.constant 0 : i32
    %c0_i32_1 = arith.constant 0 : i32
    return %c0_i32, %c0_i32_0 : i32, i32
  }
  func.func @transform_2(%arg0: i32) -> (i32, i32) {
    %c0_i32 = arith.constant 0 : i32
    %c0_i32_0 = arith.constant 0 : i32
    %c0_i32_1 = arith.constant 0 : i32
    return %c0_i32, %c0_i32_0 : i32, i32
  }
  func.func @transform_3(%arg0: i32) -> (i32, i32) {
    %c0_i32 = arith.constant 0 : i32
    %c0_i32_0 = arith.constant 0 : i32
    %c0_i32_1 = arith.constant 0 : i32
    return %c0_i32, %c0_i32_0 : i32, i32
  }
  func.func @transform_4(%arg0: i32) -> (i32, i32, i32, i32) {
    %c0_i32 = arith.constant 0 : i32
    %c0_i32_0 = arith.constant 0 : i32
    %c0_i32_1 = arith.constant 0 : i32
    %c0_i32_2 = arith.constant 0 : i32
    %c0_i32_3 = arith.constant 0 : i32
    return %c0_i32, %c0_i32_0, %c0_i32_1, %c0_i32_2 : i32, i32, i32, i32
  }
  func.func @transform_5(%arg0: i32) -> (i32, i32, i32) {
    %c0_i32 = arith.constant 0 : i32
    %c0_i32_0 = arith.constant 0 : i32
    %c0_i32_1 = arith.constant 0 : i32
    %c0_i32_2 = arith.constant 0 : i32
    return %c0_i32, %c0_i32_0, %c0_i32_1 : i32, i32, i32
  }
  func.func @transform_6(%arg0: i32) -> (i32, i32, i32, i32) {
    %c0_i32 = arith.constant 0 : i32
    %c0_i32_0 = arith.constant 0 : i32
    %c0_i32_1 = arith.constant 0 : i32
    %c0_i32_2 = arith.constant 0 : i32
    %c0_i32_3 = arith.constant 0 : i32
    return %c0_i32, %c0_i32_0, %c0_i32_1, %c0_i32_2 : i32, i32, i32, i32
  }
  func.func @transform_7(%arg0: i32) -> (i32, i32, i32) {
    %c0_i32 = arith.constant 0 : i32
    %c0_i32_0 = arith.constant 0 : i32
    %c0_i32_1 = arith.constant 0 : i32
    %c0_i32_2 = arith.constant 0 : i32
    return %c0_i32, %c0_i32_0, %c0_i32_1 : i32, i32, i32
  }
  func.func @transform_8(%arg0: i32) -> (i32, i32, i32) {
    %c0_i32 = arith.constant 0 : i32
    %c0_i32_0 = arith.constant 0 : i32
    %c0_i32_1 = arith.constant 0 : i32
    %c0_i32_2 = arith.constant 0 : i32
    return %c0_i32, %c0_i32_0, %c0_i32_1 : i32, i32, i32
  }
  func.func @transform_9(%arg0: i32) -> (i32, i32) {
    %c0_i32 = arith.constant 0 : i32
    %c0_i32_0 = arith.constant 0 : i32
    %c0_i32_1 = arith.constant 0 : i32
    return %c0_i32, %c0_i32_0 : i32, i32
  }
  func.func @transform_10(%arg0: i32) -> (i32, i32, i32) {
    %c0_i32 = arith.constant 0 : i32
    %c0_i32_0 = arith.constant 0 : i32
    %c0_i32_1 = arith.constant 0 : i32
    return %arg0, %c0_i32, %c0_i32_0 : i32, i32, i32
  }
}

</mosaic_0001>

<bundles_post_ra>
// kernel: tpu_custom_call.1
= control target key start
LH: loop header
LB: loop body
LE: loop exit
PB: predicated region body
PF: predicated region fallthrough
CT: control target
= control target key end

     0   :  { %15 = vsyncpa [#allocation3], 0  ;;  %s5099_s0 = inlined_call_operand.vmem [shape: f32[2,16,256], index: 0, kind: input, shape index: {}]   ;;  %s5100_s1 = inlined_call_operand.vmem [shape: f32[9,256], index: 1, kind: input, shape index: {}]   ;;  %s5101_s2 = inlined_call_operand.vmem [shape: f32[16,16], index: 2, kind: input, shape index: {}]   ;;  %s5102_s3 = inlined_call_operand.vmem [shape: f32[16,1], index: 3, kind: input, shape index: {}]   ;;  %s5103_s4 = inlined_call_operand.vmem [shape: f32[2,9,8,8], index: 4, kind: input, shape index: {}]   ;;  %s5104_s5 = inlined_call_operand.vmem [shape: f32[2,8,1], index: 5, kind: input, shape index: {}]   ;;  %s5105_s6 = inlined_call_operand.vmem [shape: f32[2,9,8,8], index: 6, kind: input, shape index: {}]   ;;  %s5106_s7 = inlined_call_operand.vmem [shape: f32[2,8,1], index: 7, kind: input, shape index: {}]   ;;  %s5107_s8 = inlined_call_operand.vmem [shape: f32[4,16,8], index: 8, kind: input, shape index: {}]   ;;  %s5108_s9 = inlined_call_operand.vmem [shape: f32[16,1], index: 9, kind: input, shape index: {}]   ;;  %s5109_s10 = inlined_call_operand.hbm [shape: f32[2,16,256], index: 10, kind: output, shape index: {}]  }
   0x1   :  { %17 = vsyncpa [#allocation3 + $0x1], 0  ;;  %s4312_s13 = smov 0   ;;  %s4314_s14 = smov 0  }
   0x2   :  { %s4316_s15 = smov 0   ;;  %s4318_s16 = smov 0  }
   0x3 LB: > { %s4333_s17 = sadd.s32 4294967295, %s4243_s16   ;;  %s4047_s18 = sadd.s32 4294967294, %s4243_s16   ;;  %s4243_s16 = sphi %s4318_s16, %s5132_s16   ;;  %s4239_s15 = sphi %s4316_s15, %s5131_s15   ;;  %s4235_s14 = sphi %s4314_s14, %s5130_s14   ;;  %s4231_s13 = sphi %s4312_s13, %s5129_s13  }
   0x4   : > { %s4337_s19 = sadd.s32 1, %s4243_s16   ;;  %s245_s20 = sadd.s32 1, %s4239_s15 }
   0x5   : > { %s242_s21 = ssub.s32 %s4243_s16, %s4337_s19  ;;  %p255_p0 = scmp.ne.s32.totalorder %s4239_s15, %s4235_s14 }
   0x6   : > { %p243_p1 = scmp.eq.s32.totalorder %s242_s21, 0  ;;  %p256_p2 = scmp.eq.s32.totalorder %s4333_s17, 1 }
   0x7   : > { %p261_p3 = scmp.ne.s32.totalorder %s4235_s14, %s4231_s13  ;;  %p262_p4 = scmp.eq.s32.totalorder %s4047_s18, 1 }
   0x8   : > { %s4348_s22 = scalar_select %p243_p1, %s4239_s15, %s245_s20  }
   0x9   : > { %p4350_p5 = por %p256_p2, %p255_p0  ;;  %p4354_p6 = por %p262_p4, %p261_p3 }
   0xa   : > { %p4050_p7 = scmp.ge.s32.totalorder %s4243_s16, 1  ;;  %p315_p8 = scmp.lt.s32.totalorder %s4243_s16, 3 }
   0xc   : > { %p316_p9 = pnand %p4050_p7, %p315_p8 }
   0xd   : > { %p353_p10 = scmp.lt.s32.totalorder (!%p316_p9), %s4333_s17, 1  ;;  %s5120_s28 = smov (!%p316_p9), 16  }
   0xe   : > { %319 = sbr.rel (%p316_p9) target bundleno = 1850 (0x73a), region = 60  ;;  %s4249_s11 = smov (!%p316_p9), 15  }
   0xf   : > { %s5118_s25 = smov (!%p316_p9), 1   ;;  %s5110_s12 = smov (!%p316_p9), 113  }
  0x10   : > { %s5112_s20 = smov (!%p316_p9), 111   ;;  %s5123_s21 = smov (!%p316_p9), 113  }
  0x11   : > { %s5124_s26 = smov (!%p316_p9), 112   ;;  %s350_s29 = sand.u32 (!%p316_p9), 1, %s4235_s14  }
  0x13   : > { %v4245_v0 = vmov 0.0   ;;  %v4246_v1 = vmov 0   ;;  %v369_v2 = vld [vmem:[%s5102_s3 + $0x8] sm:$0xff]  ;;  %s354_s27 = scalar_select %p353_p10, %s4333_s17, 1  ;;  %v368_v3 = vld [vmem:[%s5102_s3] sm:$0xff]  ;;  %vm380_vm0 = vcmask 130048   ;;  %v657_v29 = vlaneseq }
  0x14   : > { %451 = vmatprep.mubr.f32.mxu0 %v4245_v0  ;;  %4181 = vset.pattern.permute.xlu0 %v4246_v1  ;;  %v366_v8 = vld [vmem:[%s5101_s2] sm:$0xff]  ;;  %v367_v9 = vld [vmem:[%s5101_s2 + $0x8] sm:$0xff]  ;;  %v471_v22 = vld [vmem:[%s5107_s8 + $0x18] sm:$0xff]  ;;  %vm476_vm1 = vcmask 64512  }
  0x15   : > { %377 = vperm.xlu0 %4181, %v369_v2   ;;  %553 = vmatprep.mubr.f32.mxu1 %v4245_v0  ;;  %s4127_s30 = sshll.u32 %s354_s27, 5  ;;  %s4247_s27 = smov 17   ;;  %v470_v25 = vld [vmem:[%s5107_s8 + $0x10] sm:$0xff]  ;;  %v468_v26 = vld [vmem:[%s5107_s8] sm:$0xff]  ;;  %v469_v27 = vld [vmem:[%s5107_s8 + $0x8] sm:$0xff]  ;;  %v4444_v30 = vshrl.u32 %v657_v29, 7 }
  0x16   : > { %4182 = vset.pattern.permute.xlu1 %v4246_v1  ;;  %s357_s18 = scalar_lea.vmem %s5099_s0, %s4127_s30  ;;  %s5116_s30 = smov 127   ;;  %v652_v28 = vld [vmem:[%s5104_s5] sm:$0xff]  ;;  %v4446_v31 = vand.u32 127, %v657_v29  ;;  %v4457_v34 = vld [vmem:[%s5100_s1 + $0x8] sm:$0xff] }
  0x17   : > { %v361_v4 = vld [vmem:[%s357_s18 + $0x18] sm:$0xff]  ;;  %v360_v5 = vld [vmem:[%s357_s18 + $0x10] sm:$0xff]  ;;  %v359_v6 = vld [vmem:[%s357_s18 + $0x8] sm:$0xff]  ;;  %v681_v32 = vsub.s32 1, %v4444_v30  ;;  %v664_v39 = vsub.s32 0, %v4444_v30  ;;  %v846_v44 = vsub.s32 2, %v4444_v30 }
  0x18   : > { %415 = vmatprep.subr.mxu0 %v361_v4  ;;  %v358_v7 = vld [vmem:[%s357_s18] sm:$0xff]  ;;  %s5114_s18 = smov 112   ;;  %vm676_vm2 = vcmp.lt.s32.totalorder %v4446_v31, 16  ;;  %vm659_vm3 = vcmp.lt.s32.totalorder %v4446_v31, 17  ;;  %v644_v49 = vld [vmem:[%s5103_s4 + $0x8] sm:$0xff]  ;;  %vm841_vm4 = vcmp.lt.s32.totalorder %v4446_v31, 15 }
  0x19   : > { %372 = vperm.xlu0 %4181, %v368_v3   ;;  %416 = vmatpush1.msra.mxu0 %v360_v5  ;;  %v4452_v33 = vld [vmem:[%s5100_s1] sm:$0xff]  ;;  %v4464_v38 = vrot.slane %v4457_v34, %v681_v32  ;;  %v4479_v48 = vrot.slane %v4457_v34, %v664_v39  ;;  %v4495_v57 = vrot.slane %v4457_v34, %v846_v44  ;;  %v939_v58 = vsub.s32 3, %v4444_v30 }
  0x1a   : > { %417 = vmatprep.subr.mxu0 %v359_v6  ;;  %v4461_v37 = vrot.slane %v4452_v33, %v681_v32  ;;  %v4476_v47 = vrot.slane %v4452_v33, %v664_v39  ;;  %v4490_v54 = vrot.slane %v4452_v33, %v846_v44  ;;  %v643_v59 = vld [vmem:[%s5103_s4] sm:$0xff]  ;;  %vm934_vm5 = vcmp.lt.s32.totalorder %v4446_v31, 1  ;;  %v645_v6 = vld [vmem:[%s5103_s4 + $0x10] sm:$0xff] }
  0x1b   : > { %418 = vmatpush1.msra.mxu0 %v358_v7  ;;  %v1108_v63 = vsub.s32 5, %v4444_v30  ;;  %v4512_v4 = vrot.slane %v4452_v33, %v939_v58  ;;  %v4515_v5 = vrot.slane %v4457_v34, %v939_v58  ;;  %vm1103_vm6 = vcmp.lt.s32.totalorder %v4446_v31, 127  ;;  %v4596_v44 = vld [vmem:[%s5100_s1 + $0x10] ss:$0 sm:$0xff] }
  0x1c   : > { %4054 = vmatmul.mubr.msk.f32.vlgmr.msra.gmra.mxu0 %vm380_vm0, %v366_v8  ;;  %vm1196_vm7 = vcmp.lt.s32.totalorder %v4446_v31, 113  ;;  %vm1289_vm8 = vcmp.lt.s32.totalorder %v4446_v31, 112  ;;  %vm1382_vm9 = vcmp.lt.s32.totalorder %v4446_v31, 111 }
  0x1d   : > { %457 = vmatprep.mubr.f32.mxu0 %v4245_v0 }
  0x20   : > { %4055 = vmatmul.mubr.msk.f32.gmra.mxu0 %vm380_vm0, %v367_v9 }
  0x21   : > { %547 = vmatprep.mubr.f32.mxu0 %v4245_v0 }
  0x90   : > { %v378_v10 = vpop.permute.xlu0 %377 }
  0x94   : > { %v373_v15 = vpop.permute.xlu0 %372 }
  0xdc   : > { %v453_v11 = vpop.f32.mrf.mxu0 }
  0xdd   : > { %v454_v20 = vadd.f32 %v453_v11, %v373_v15  ;;  %v1201_v11 = vsub.s32 6, %v4444_v30 }
  0xde   : > { %v455_v12 = vpop.f32.mrf.mxu0 }
  0xdf   : > { %v456_v19 = vadd.f32 %v455_v12, %v373_v15  ;;  %v464_v24 = vmax.f32 %v454_v20, 0.0  ;;  %v646_v15 = vld [vmem:[%s5103_s4 + $0x18] sm:$0xff] }
  0xe0   : > { %v459_v13 = vpop.f32.mrf.mxu0 }
  0xe1   : > { %v460_v14 = vadd.f32 %v459_v13, %v378_v10  ;;  %v465_v23 = vmax.f32 %v456_v19, 0.0 }
  0xe2   : > { %v461_v16 = vpop.f32.mrf.mxu0 }
  0xe3   : > { %v4381_v17 = vmax.f32 %v460_v14, 0.0  ;;  %v462_v18 = vadd.f32 %v461_v16, %v378_v10  ;;  %v4527_v10 = vrot.slane %v4452_v33, %v1108_v63  ;;  %v4536_v14 = vrot.slane %v4457_v34, %v1108_v63  ;;  %v647_v16 = vld [vmem:[%s5103_s4 + $0x20] sm:$0xff] }
  0xe5   : > { %v4383_v21 = vmax.f32 %v462_v18, 0.0  ;;  %653 = vrot.lane.b32.xlu0 %v4381_v17, %s4247_s27  ;;  %672 = vrot.lane.b32.xlu1 %v4381_v17, %s5120_s28 }
  0xe7   : > { %513 = vmatprep.subr.mxu0 %v4383_v21  ;;  %4129 = vmatprep.subr.mxu1 %v4383_v21 }
  0xe8   : > { %514 = vmatpush1.msra.mxu0 %v4381_v17  ;;  %4130 = vmatpush1.msra.mxu1 %v4381_v17 }
  0xe9   : > { %837 = vrot.lane.b32.xlu0 %v4381_v17, %s4249_s11  ;;  %674 = vrot.lane.b32.xlu1 %v4383_v21, %s5120_s28 }
  0xea   : > { %596 = vmatprep.subr.mxu1 %v465_v23  ;;  %4057 = vmatmul.mubr.msk.f32.vlgmr.msra.gmra.mxu1 %vm476_vm1, %v471_v22 }
  0xeb   : > { %597 = vmatpush1.msra.mxu1 %v464_v24  ;;  %630 = vmatprep.mubr.f32.mxu1 %v4245_v0  ;;  %v4558_v24 = vrot.slane %v4457_v34, %v1201_v11 }
  0xec   : > { %4056 = vmatmul.mubr.msk.f32.vlgmr.msra.gmra.mxu0 %vm476_vm1, %v470_v25  ;;  %v1294_v25 = vsub.s32 7, %v4444_v30 }
  0xed   : > { %930 = vrot.lane.b32.xlu0 %v4381_v17, %s5118_s25  ;;  %655 = vrot.lane.b32.xlu1 %v4383_v21, %s4247_s27 }
  0xee   : > { %4058 = vmatmul.mubr.msk.f32.vlgmr.msra.gmra.mxu1 %vm476_vm1, %v468_v26  ;;  %756 = vmatprep.mubr.f32.mxu0 %v4245_v0  ;;  %v648_v26 = vld [vmem:[%s5103_s4 + $0x28] sm:$0xff]  ;;  %v4579_v39 = vrot.slane %v4457_v34, %v1294_v25 }
  0xef   : > { %636 = vmatprep.mubr.f32.mxu1 %v4245_v0 }
  0xf1   : > { %1099 = vrot.lane.b32.xlu0 %v4381_v17, %s5116_s30  ;;  %839 = vrot.lane.b32.xlu1 %v4383_v21, %s4249_s11 }
  0xf2   : > { %4059 = vmatmul.mubr.msk.f32.gmra.mxu1 %vm476_vm1, %v469_v27 }
  0xf3   : > { %921 = vmatprep.mubr.f32.mxu1 %v4245_v0 }
  0xf5   : > { %1192 = vrot.lane.b32.xlu0 %v4381_v17, %s5110_s12  ;;  %932 = vrot.lane.b32.xlu1 %v4383_v21, %s5118_s25 }
  0xf9   : > { %1285 = vrot.lane.b32.xlu0 %v4381_v17, %s5114_s18  ;;  %1101 = vrot.lane.b32.xlu1 %v4383_v21, %s5116_s30 }
  0xfd   : > { %1378 = vrot.lane.b32.xlu0 %v4381_v17, %s5112_s20  ;;  %1194 = vrot.lane.b32.xlu1 %v4383_v21, %s5110_s12  ;;  %s5125_s12 = smov 111  }
 0x101   : > { %1473 = vperm.xlu0 %4181, %v652_v28   ;;  %1287 = vrot.lane.b32.xlu1 %v4383_v21, %s5114_s18 }
 0x105   : > { %1380 = vrot.lane.b32.xlu1 %v4383_v21, %s5112_s20 }
 0x157   : > { %v654_v35 = vpop.permute.xlu0 %653  ;;  %v673_v36 = vpop.permute.xlu1 %672 }
 0x15b   : > { %v838_v40 = vpop.permute.xlu0 %837  ;;  %v675_v41 = vpop.permute.xlu1 %674 }
 0x15c   : > { %v677_v42 = vsel %vm676_vm2, %v673_v36, %v675_v41  ;;  %v678_v43 = vsel %vm676_vm2, %v675_v41, %v673_v36  ;;  %v4576_v36 = vrot.slane %v4452_v33, %v1294_v25 }
 0x15d   : > { %v687_v45 = vmul.f32 %v4461_v37, %v678_v43  ;;  %v688_v46 = vmul.f32 %v4464_v38, %v677_v42 }
 0x15f   : > { %v931_v50 = vpop.permute.xlu0 %930  ;;  %v656_v51 = vpop.permute.xlu1 %655  ;;  %722 = vmatprep.subr.mxu0 %v688_v46  ;;  %v650_v46 = vld [vmem:[%s5103_s4 + $0x38] sm:$0xff] }
 0x160   : > { %v660_v52 = vsel %vm659_vm3, %v654_v35, %v656_v51  ;;  %v661_v53 = vsel %vm659_vm3, %v656_v51, %v654_v35  ;;  %723 = vmatpush1.msra.mxu0 %v687_v45  ;;  %v4601_v45 = vld [vmem:[%s5100_s1 + $0x18] ss:$0 sm:$0xff] }
 0x161   : > { %v670_v55 = vmul.f32 %v4476_v47, %v661_v53  ;;  %v671_v56 = vmul.f32 %v4479_v48, %v660_v52  ;;  %4060 = vmatmul.mubr.msk.f32.vlgmr.msra.gmra.mxu0 %vm476_vm1, %v644_v49 }
 0x162   : > { %830 = vmatprep.mubr.f32.mxu0 %v4245_v0 }
 0x163   : > { %v840_v60 = vpop.permute.xlu1 %839  ;;  %796 = vmatprep.subr.mxu0 %v671_v56  ;;  %v1100_v1 = vpop.permute.xlu0 %1099  ;;  %v651_v56 = vld [vmem:[%s5103_s4 + $0x40] sm:$0xff] }
 0x164   : > { %v842_v61 = vsel %vm841_vm4, %v838_v40, %v840_v60  ;;  %v843_v62 = vsel %vm841_vm4, %v840_v60, %v838_v40  ;;  %797 = vmatpush1.msra.mxu0 %v670_v55  ;;  %v649_v40 = vld [vmem:[%s5103_s4 + $0x30] sm:$0xff] }
 0x165   : > { %v852_v2 = vmul.f32 %v4490_v54, %v843_v62  ;;  %v853_v3 = vmul.f32 %v4495_v57, %v842_v61  ;;  %4061 = vmatmul.mubr.msk.f32.vlgmr.msra.gmra.mxu0 %vm476_vm1, %v643_v59 }
 0x166   : > { %1014 = vmatprep.mubr.f32.mxu0 %v4245_v0 }
 0x167   : > { %v933_v7 = vpop.permute.xlu1 %932  ;;  %887 = vmatprep.subr.mxu1 %v853_v3  ;;  %v1193_v18 = vpop.permute.xlu0 %1192 }
 0x168   : > { %v935_v8 = vsel %vm934_vm5, %v931_v50, %v933_v7  ;;  %v936_v9 = vsel %vm934_vm5, %v933_v7, %v931_v50  ;;  %888 = vmatpush1.msra.mxu1 %v852_v2 }
 0x169   : > { %v945_v12 = vmul.f32 %v4512_v4, %v936_v9  ;;  %v946_v13 = vmul.f32 %v4515_v5, %v935_v8  ;;  %1056 = vmatprep.subr.mxu1 %v4383_v21  ;;  %4062 = vmatmul.mubr.msk.f32.vlgmr.msra.gmra.mxu1 %vm476_vm1, %v645_v6 }
 0x16a   : > { %1057 = vmatpush1.msra.mxu1 %v4381_v17  ;;  %1090 = vmatprep.mubr.f32.mxu1 %v4245_v0  ;;  %v4552_v17 = vrot.slane %v4452_v33, %v1201_v11 }
 0x16b   : > { %v1102_v19 = vpop.permute.xlu1 %1101  ;;  %980 = vmatprep.subr.mxu0 %v946_v13  ;;  %v1286_v30 = vpop.permute.xlu0 %1285 }
 0x16c   : > { %v1104_v20 = vsel %vm1103_vm6, %v1100_v1, %v1102_v19  ;;  %v1105_v21 = vsel %vm1103_vm6, %v1102_v19, %v1100_v1  ;;  %981 = vmatpush1.msra.mxu0 %v945_v12 }
 0x16d   : > { %v1114_v22 = vmul.f32 %v4527_v10, %v1104_v20  ;;  %v1115_v23 = vmul.f32 %v4536_v14, %v1105_v21  ;;  %4063 = vmatmul.mubr.msk.f32.vlgmr.msra.gmra.mxu0 %vm476_vm1, %v646_v15  ;;  %4064 = vmatmul.mubr.msk.f32.vlgmr.msra.gmra.mxu1 %vm476_vm1, %v647_v16 }
 0x16e   : > { %1183 = vmatprep.mubr.f32.mxu0 %v4245_v0  ;;  %1276 = vmatprep.mubr.f32.mxu1 %v4245_v0 }
 0x16f   : > { %v1195_v27 = vpop.permute.xlu1 %1194  ;;  %1149 = vmatprep.subr.mxu0 %v1115_v23  ;;  %v1379_v49 = vpop.permute.xlu0 %1378 }
 0x170   : > { %v1197_v28 = vsel %vm1196_vm7, %v1193_v18, %v1195_v27  ;;  %v1198_v29 = vsel %vm1196_vm7, %v1195_v27, %v1193_v18  ;;  %1150 = vmatpush1.msra.mxu0 %v1114_v22 }
 0x171   : > { %v1207_v32 = vmul.f32 %v4552_v17, %v1197_v28  ;;  %v1208_v35 = vmul.f32 %v4558_v24, %v1198_v29  ;;  %4065 = vmatmul.mubr.msk.f32.vlgmr.msra.gmra.mxu0 %vm476_vm1, %v648_v26 }
 0x172   : > { %1369 = vmatprep.mubr.f32.mxu0 %v4245_v0 }
 0x173   : > { %v1288_v41 = vpop.permute.xlu1 %1287  ;;  %1242 = vmatprep.subr.mxu1 %v1208_v35 }
 0x174   : > { %v1290_v42 = vsel %vm1289_vm8, %v1286_v30, %v1288_v41  ;;  %v1291_v43 = vsel %vm1289_vm8, %v1288_v41, %v1286_v30  ;;  %1243 = vmatpush1.msra.mxu1 %v1207_v32 }
 0x175   : > { %v1300_v33 = vmul.f32 %v4576_v36, %v1290_v42  ;;  %v1301_v34 = vmul.f32 %v4579_v39, %v1291_v43  ;;  %4066 = vmatmul.mubr.msk.f32.vlgmr.msra.gmra.mxu1 %vm476_vm1, %v649_v40 }
 0x176   : > { %1462 = vmatprep.mubr.f32.mxu1 %v4245_v0 }
 0x177   : > { %v1381_v50 = vpop.permute.xlu1 %1380  ;;  %1335 = vmatprep.subr.mxu0 %v1301_v34 }
 0x178   : > { %v1383_v51 = vsel %vm1382_vm9, %v1379_v49, %v1381_v50  ;;  %v1384_v52 = vsel %vm1382_vm9, %v1381_v50, %v1379_v49  ;;  %1336 = vmatpush1.msra.mxu0 %v1300_v33 }
 0x179   : > { %v1393_v53 = vmul.f32 %v4596_v44, %v1383_v51  ;;  %v1394_v55 = vmul.f32 %v4601_v45, %v1384_v52  ;;  %4067 = vmatmul.mubr.msk.f32.vlgmr.msra.gmra.mxu0 %vm476_vm1, %v650_v46 }
 0x17a   : > { %1573 = vmatprep.mubr.f32.mxu0 %v4245_v0 }
 0x17b   : > { %1428 = vmatprep.subr.mxu1 %v1394_v55 }
 0x17c   : > { %1429 = vmatpush1.msra.mxu1 %v1393_v53  ;;  %v1474_v52 = vpop.permute.xlu0 %1473 }
 0x17d   : > { %4070 = vmatmul.mubr.msk.f32.vlgmr.msra.gmra.mxu1 %vm476_vm1, %v651_v56 }
 0x17e   : > { %1647 = vmatprep.mubr.f32.mxu1 %v4245_v0 }
 0x1aa   : > { %v555_v58 = vpop.f32.mrf.mxu1 }
 0x1ac   : > { %v4620_v59 = vpop.f32.mrf.mxu1  ;;  %v549_v61 = vpop.f32.mrf.mxu0 }
 0x1ae   : > { %v632_v60 = vpop.f32.mrf.mxu1  ;;  %v4628_v3 = vpop.f32.mrf.mxu0 }
 0x1af   : > { %v4622_v62 = vadd.f32 %v632_v60, %v549_v61 }
 0x1b0   : > { %v4624_v63 = vpop.f32.mrf.mxu1 }
 0x1b2   : > { %v638_v1 = vpop.f32.mrf.mxu1 }
 0x1b3   : > { %v4626_v2 = vadd.f32 %v638_v1, %v555_v58  ;;  %v1489_v1 = vld [vmem:[%s5106_s7] sm:$0xff] }
 0x1b4   : > { %v4630_v11 = vpop.f32.mrf.mxu1 }
 0x221   : > { %v758_v6 = vpop.f32.mrf.mxu0 }
 0x223   : > { %v760_v7 = vpop.f32.mrf.mxu0 }
 0x225   : > { %v832_v8 = vpop.f32.mrf.mxu0 }
 0x226   : > { %v833_v9 = vadd.f32 %v832_v8, %v758_v6 }
 0x227   : > { %v834_v12 = vpop.f32.mrf.mxu0 }
 0x228   : > { %v835_v15 = vadd.f32 %v834_v12, %v760_v7 }
 0x229   : > { %v923_v13 = vpop.f32.mrf.mxu1 }
 0x22a   : > { %v928_v16 = vadd.f32 %v923_v13, %v833_v9 }
 0x22b   : > { %v925_v18 = vpop.f32.mrf.mxu1 }
 0x22c   : > { %v929_v20 = vadd.f32 %v925_v18, %v835_v15 }
 0x22d   : > { %v1016_v19 = vpop.f32.mrf.mxu0  ;;  %v1092_v23 = vpop.f32.mrf.mxu1 }
 0x22e   : > { %v1021_v21 = vadd.f32 %v1016_v19, %v928_v16  ;;  %v1481_v16 = vld [vmem:[%s5105_s6 + $0x8] sm:$0xff] }
 0x22f   : > { %v1018_v22 = vpop.f32.mrf.mxu0  ;;  %v1094_v27 = vpop.f32.mrf.mxu1 }
 0x230   : > { %v1022_v25 = vadd.f32 %v1018_v22, %v929_v20  ;;  %v1097_v26 = vadd.f32 %v1092_v23, %v1021_v21 }
 0x231   : > { %v1185_v28 = vpop.f32.mrf.mxu0 }
 0x232   : > { %v1098_v30 = vadd.f32 %v1094_v27, %v1022_v25  ;;  %v1190_v32 = vadd.f32 %v1185_v28, %v1097_v26  ;;  %v1480_v25 = vld [vmem:[%s5105_s6] sm:$0xff] }
 0x233   : > { %v1187_v35 = vpop.f32.mrf.mxu0 }
 0x234   : > { %v1191_v42 = vadd.f32 %v1187_v35, %v1098_v30  ;;  %v1482_v35 = vld [vmem:[%s5105_s6 + $0x10] sm:$0xff] }
 0x235   : > { %v1278_v29 = vpop.f32.mrf.mxu1 }
 0x236   : > { %v1283_v43 = vadd.f32 %v1278_v29, %v1190_v32 }
 0x237   : > { %v1280_v40 = vpop.f32.mrf.mxu1 }
 0x238   : > { %v1284_v34 = vadd.f32 %v1280_v40, %v1191_v42 }
 0x239   : > { %v1371_v41 = vpop.f32.mrf.mxu0 }
 0x23a   : > { %v1376_v46 = vadd.f32 %v1371_v41, %v1283_v43 }
 0x23b   : > { %v1373_v33 = vpop.f32.mrf.mxu0 }
 0x23c   : > { %v1377_v50 = vadd.f32 %v1373_v33, %v1284_v34 }
 0x23d   : > { %v1464_v49 = vpop.f32.mrf.mxu1 }
 0x23e   : > { %v1469_v51 = vadd.f32 %v1464_v49, %v1376_v46  ;;  %v1483_v46 = vld [vmem:[%s5105_s6 + $0x18] sm:$0xff]  ;;  %v1484_v49 = vld [vmem:[%s5105_s6 + $0x20] sm:$0xff] }
 0x23f   : > { %v1466_v53 = vpop.f32.mrf.mxu1 }
 0x240   : > { %v1476_v55 = vadd.f32 %v1474_v52, %v1469_v51  ;;  %v1470_v56 = vadd.f32 %v1466_v53, %v1377_v50 }
 0x242   : > { %v1478_v58 = vmax.f32 %v1476_v55, 0.0  ;;  %v1477_v60 = vadd.f32 %v1474_v52, %v1470_v56 }
 0x244   : > { %v1479_v61 = vmax.f32 %v1477_v60, 0.0  ;;  %1498 = vrot.lane.b32.xlu1 %v1478_v58, %s5120_s28 }
 0x246   : > { %1500 = vrot.lane.b32.xlu0 %v1479_v61, %s5120_s28 }
 0x248   : > { %1490 = vrot.lane.b32.xlu1 %v1478_v58, %s4247_s27 }
 0x24a   : > { %1492 = vrot.lane.b32.xlu0 %v1479_v61, %s4247_s27 }
 0x24c   : > { %1654 = vrot.lane.b32.xlu1 %v1478_v58, %s4249_s11 }
 0x24e   : > { %1656 = vrot.lane.b32.xlu0 %v1479_v61, %s4249_s11 }
 0x250   : > { %1738 = vrot.lane.b32.xlu1 %v1478_v58, %s5118_s25 }
 0x252   : > { %1740 = vrot.lane.b32.xlu0 %v1479_v61, %s5118_s25 }
 0x254   : > { %1898 = vrot.lane.b32.xlu1 %v1478_v58, %s5116_s30 }
 0x256   : > { %1900 = vrot.lane.b32.xlu0 %v1479_v61, %s5116_s30  ;;  %s5126_s30 = smov 127  }
 0x258   : > { %1982 = vrot.lane.b32.xlu1 %v1478_v58, %s5123_s21 }
 0x25a   : > { %1984 = vrot.lane.b32.xlu0 %v1479_v61, %s5123_s21 }
 0x25c   : > { %2066 = vrot.lane.b32.xlu1 %v1478_v58, %s5124_s26 }
 0x25e   : > { %2068 = vrot.lane.b32.xlu0 %v1479_v61, %s5124_s26 }
 0x260   : > { %2150 = vrot.lane.b32.xlu1 %v1478_v58, %s5125_s12 }
 0x262   : > { %2152 = vrot.lane.b32.xlu0 %v1479_v61, %s5125_s12 }
 0x264   : > { %2236 = vperm.xlu1 %4182, %v1489_v1  }
 0x2b6   : > { %v1499_v6 = vpop.permute.xlu1 %1498 }
 0x2b8   : > { %v1501_v7 = vpop.permute.xlu0 %1500 }
 0x2b9   : > { %v1502_v8 = vsel %vm676_vm2, %v1499_v6, %v1501_v7  ;;  %v1503_v9 = vsel %vm676_vm2, %v1501_v7, %v1499_v6 }
 0x2ba   : > { %v1504_v12 = vmul.f32 %v1503_v9, %v4461_v37  ;;  %v1505_v13 = vmul.f32 %v1502_v8, %v4464_v38  ;;  %v1491_v15 = vpop.permute.xlu1 %1490  ;;  %v1486_v9 = vld [vmem:[%s5105_s6 + $0x30] sm:$0xff] }
 0x2bc   : > { %1539 = vmatprep.subr.mxu0 %v1505_v13  ;;  %v1493_v18 = vpop.permute.xlu0 %1492 }
 0x2bd   : > { %v1494_v19 = vsel %vm659_vm3, %v1491_v15, %v1493_v18  ;;  %v1495_v20 = vsel %vm659_vm3, %v1493_v18, %v1491_v15  ;;  %1540 = vmatpush1.msra.mxu0 %v1504_v12 }
 0x2be   : > { %v1496_v21 = vmul.f32 %v1495_v20, %v4476_v47  ;;  %v1497_v22 = vmul.f32 %v1494_v19, %v4479_v48  ;;  %v1655_v23 = vpop.permute.xlu1 %1654  ;;  %4071 = vmatmul.mubr.msk.f32.vlgmr.msra.gmra.mxu0 %vm476_vm1, %v1481_v16  ;;  %v1487_v19 = vld [vmem:[%s5105_s6 + $0x38] sm:$0xff] }
 0x2bf   : > { %1729 = vmatprep.mubr.f32.mxu0 %v4245_v0 }
 0x2c0   : > { %1613 = vmatprep.subr.mxu1 %v1497_v22  ;;  %v1657_v26 = vpop.permute.xlu0 %1656 }
 0x2c1   : > { %v1658_v27 = vsel %vm841_vm4, %v1655_v23, %v1657_v26  ;;  %v1659_v28 = vsel %vm841_vm4, %v1657_v26, %v1655_v23  ;;  %1614 = vmatpush1.msra.mxu1 %v1496_v21 }
 0x2c2   : > { %v1660_v29 = vmul.f32 %v1659_v28, %v4490_v54  ;;  %v1661_v30 = vmul.f32 %v1658_v27, %v4495_v57  ;;  %v1739_v32 = vpop.permute.xlu1 %1738  ;;  %4072 = vmatmul.mubr.msk.f32.vlgmr.msra.gmra.mxu1 %vm476_vm1, %v1480_v25  ;;  %v1488_v27 = vld [vmem:[%s5105_s6 + $0x40] sm:$0xff] }
 0x2c3   : > { %1813 = vmatprep.mubr.f32.mxu1 %v4245_v0 }
 0x2c4   : > { %1695 = vmatprep.subr.mxu0 %v1661_v30  ;;  %v1741_v40 = vpop.permute.xlu0 %1740 }
 0x2c5   : > { %v1742_v41 = vsel %vm934_vm5, %v1739_v32, %v1741_v40  ;;  %v1743_v42 = vsel %vm934_vm5, %v1741_v40, %v1739_v32  ;;  %1696 = vmatpush1.msra.mxu0 %v1660_v29 }
 0x2c6   : > { %v1744_v43 = vmul.f32 %v1743_v42, %v4512_v4  ;;  %v1745_v33 = vmul.f32 %v1742_v41, %v4515_v5  ;;  %v1899_v34 = vpop.permute.xlu1 %1898  ;;  %1855 = vmatprep.subr.mxu0 %v1479_v61  ;;  %4073 = vmatmul.mubr.msk.f32.vlgmr.msra.gmra.mxu0 %vm476_vm1, %v1482_v35 }
 0x2c7   : > { %1856 = vmatpush1.msra.mxu0 %v1478_v58  ;;  %1889 = vmatprep.mubr.f32.mxu0 %v4245_v0  ;;  %v1485_v58 = vld [vmem:[%s5105_s6 + $0x28] sm:$0xff] }
 0x2c8   : > { %1779 = vmatprep.subr.mxu1 %v1745_v33  ;;  %v1901_v50 = vpop.permute.xlu0 %1900 }
 0x2c9   : > { %v1902_v51 = vsel %vm1103_vm6, %v1899_v34, %v1901_v50  ;;  %v1903_v52 = vsel %vm1103_vm6, %v1901_v50, %v1899_v34  ;;  %1780 = vmatpush1.msra.mxu1 %v1744_v43 }
 0x2ca   : > { %v1904_v53 = vmul.f32 %v1902_v51, %v4527_v10  ;;  %v1905_v55 = vmul.f32 %v1903_v52, %v4536_v14  ;;  %v1983_v56 = vpop.permute.xlu1 %1982  ;;  %4074 = vmatmul.mubr.msk.f32.vlgmr.msra.gmra.mxu1 %vm476_vm1, %v1483_v46  ;;  %4075 = vmatmul.mubr.msk.f32.vlgmr.msra.gmra.mxu0 %vm476_vm1, %v1484_v49 }
 0x2cb   : > { %1973 = vmatprep.mubr.f32.mxu1 %v4245_v0  ;;  %2057 = vmatprep.mubr.f32.mxu0 %v4245_v0 }
 0x2cc   : > { %1939 = vmatprep.subr.mxu1 %v1905_v55  ;;  %v1985_v60 = vpop.permute.xlu0 %1984 }
 0x2cd   : > { %v1986_v61 = vsel %vm1196_vm7, %v1983_v56, %v1985_v60  ;;  %v1987_v1 = vsel %vm1196_vm7, %v1985_v60, %v1983_v56  ;;  %1940 = vmatpush1.msra.mxu1 %v1904_v53 }
 0x2ce   : > { %v1988_v6 = vmul.f32 %v1986_v61, %v4552_v17  ;;  %v1989_v7 = vmul.f32 %v1987_v1, %v4558_v24  ;;  %v2067_v8 = vpop.permute.xlu1 %2066  ;;  %4076 = vmatmul.mubr.msk.f32.vlgmr.msra.gmra.mxu1 %vm476_vm1, %v1485_v58 }
 0x2cf   : > { %2141 = vmatprep.mubr.f32.mxu1 %v4245_v0 }
 0x2d0   : > { %2023 = vmatprep.subr.mxu0 %v1989_v7  ;;  %v2069_v12 = vpop.permute.xlu0 %2068 }
 0x2d1   : > { %v2070_v13 = vsel %vm1289_vm8, %v2067_v8, %v2069_v12  ;;  %v2071_v15 = vsel %vm1289_vm8, %v2069_v12, %v2067_v8  ;;  %2024 = vmatpush1.msra.mxu0 %v1988_v6 }
 0x2d2   : > { %v2072_v16 = vmul.f32 %v2070_v13, %v4576_v36  ;;  %v2073_v18 = vmul.f32 %v2071_v15, %v4579_v39  ;;  %4077 = vmatmul.mubr.msk.f32.vlgmr.msra.gmra.mxu0 %vm476_vm1, %v1486_v9  ;;  %v2151_v20 = vpop.permute.xlu1 %2150 }
 0x2d3   : > { %2225 = vmatprep.mubr.f32.mxu0 %v4245_v0 }
 0x2d4   : > { %2107 = vmatprep.subr.mxu1 %v2073_v18  ;;  %v2153_v21 = vpop.permute.xlu0 %2152 }
 0x2d5   : > { %v2154_v22 = vsel %vm1382_vm9, %v2151_v20, %v2153_v21  ;;  %v2155_v23 = vsel %vm1382_vm9, %v2153_v21, %v2151_v20  ;;  %2108 = vmatpush1.msra.mxu1 %v2072_v16 }
 0x2d6   : > { %v2156_v25 = vmul.f32 %v4596_v44, %v2154_v22  ;;  %v2157_v26 = vmul.f32 %v4601_v45, %v2155_v23  ;;  %4078 = vmatmul.mubr.msk.f32.vlgmr.msra.gmra.mxu1 %vm476_vm1, %v1487_v19 }
 0x2d7   : > { %2313 = vmatprep.mubr.f32.mxu1 %v4245_v0 }
 0x2d8   : > { %2191 = vmatprep.subr.mxu0 %v2157_v26 }
 0x2d9   : > { %2192 = vmatpush1.msra.mxu0 %v2156_v25 }
 0x2da   : > { %4079 = vmatmul.mubr.msk.f32.vlgmr.msra.gmra.mxu0 %vm476_vm1, %v1488_v27  ;;  %v472_v27 = vld [vmem:[%s5107_s8 + $0x20] sm:$0xff] }
 0x2db   : > { %2425 = vmatprep.mubr.f32.mxu0 %v4245_v0 }
 0x2df   : > { %v2237_v16 = vpop.permute.xlu1 %2236 }
 0x37e   : > { %v1575_v28 = vpop.f32.mrf.mxu0 }
 0x380   : > { %v1577_v29 = vpop.f32.mrf.mxu0 }
 0x382   : > { %v1649_v30 = vpop.f32.mrf.mxu1 }
 0x383   : > { %v1650_v32 = vadd.f32 %v1649_v30, %v1575_v28  ;;  %v473_v28 = vld [vmem:[%s5107_s8 + $0x28] sm:$0xff] }
 0x384   : > { %v1651_v35 = vpop.f32.mrf.mxu1 }
 0x385   : > { %v1652_v40 = vadd.f32 %v1651_v35, %v1577_v29  ;;  %v4091_v29 = vld [vmem:[%s5104_s5 + $0x8] sm:$0xff] }
 0x386   : > { %v1731_v41 = vpop.f32.mrf.mxu0 }
 0x387   : > { %v1736_v42 = vadd.f32 %v1731_v41, %v1650_v32 }
 0x388   : > { %v1733_v43 = vpop.f32.mrf.mxu0 }
 0x389   : > { %v1737_v33 = vadd.f32 %v1733_v43, %v1652_v40 }
 0x38a   : > { %v1815_v34 = vpop.f32.mrf.mxu1  ;;  %v1891_v46 = vpop.f32.mrf.mxu0 }
 0x38b   : > { %v1820_v49 = vadd.f32 %v1815_v34, %v1736_v42 }
 0x38c   : > { %v1817_v50 = vpop.f32.mrf.mxu1  ;;  %v1893_v53 = vpop.f32.mrf.mxu0 }
 0x38d   : > { %v1821_v51 = vadd.f32 %v1817_v50, %v1737_v33  ;;  %v1896_v52 = vadd.f32 %v1891_v46, %v1820_v49  ;;  %v4083_v33 = vld [vmem:[%s5103_s4 + $0x50] sm:$0xff] }
 0x38e   : > { %v1975_v55 = vpop.f32.mrf.mxu1 }
 0x38f   : > { %v1897_v56 = vadd.f32 %v1893_v53, %v1821_v51  ;;  %v1980_v58 = vadd.f32 %v1975_v55, %v1896_v52  ;;  %v4082_v53 = vld [vmem:[%s5103_s4 + $0x48] sm:$0xff] }
 0x390   : > { %v1977_v60 = vpop.f32.mrf.mxu1 }
 0x391   : > { %v1981_v1 = vadd.f32 %v1977_v60, %v1897_v56 }
 0x392   : > { %v2059_v61 = vpop.f32.mrf.mxu0 }
 0x393   : > { %v2064_v6 = vadd.f32 %v2059_v61, %v1980_v58 }
 0x394   : > { %v2061_v7 = vpop.f32.mrf.mxu0 }
 0x395   : > { %v2065_v12 = vadd.f32 %v2061_v7, %v1981_v1 }
 0x396   : > { %v2143_v8 = vpop.f32.mrf.mxu1 }
 0x397   : > { %v2148_v13 = vadd.f32 %v2143_v8, %v2064_v6  ;;  %v4084_v6 = vld [vmem:[%s5103_s4 + $0x58] sm:$0xff] }
 0x398   : > { %v2145_v9 = vpop.f32.mrf.mxu1 }
 0x399   : > { %v2149_v18 = vadd.f32 %v2145_v9, %v2065_v12 }
 0x39a   : > { %v2227_v15 = vpop.f32.mrf.mxu0 }
 0x39b   : > { %v2232_v19 = vadd.f32 %v2227_v15, %v2148_v13 }
 0x39c   : > { %v2229_v20 = vpop.f32.mrf.mxu0 }
 0x39d   : > { %v2239_v21 = vadd.f32 %v2237_v16, %v2232_v19  ;;  %v2233_v22 = vadd.f32 %v2229_v20, %v2149_v18  ;;  %v4086_v18 = vld [vmem:[%s5103_s4 + $0x68] sm:$0xff] }
 0x39f   : > { %v4744_v23 = vmax.f32 %v2239_v21, 0.0  ;;  %v2240_v25 = vadd.f32 %v2237_v16, %v2233_v22  ;;  %v4085_v16 = vld [vmem:[%s5103_s4 + $0x60] sm:$0xff] }
 0x3a1   : > { %v4746_v26 = vmax.f32 %v2240_v25, 0.0  ;;  %2350 = vrot.lane.b32.xlu0 %v4744_v23, %s5120_s28 }
 0x3a3   : > { %2352 = vrot.lane.b32.xlu1 %v4746_v26, %s5120_s28  ;;  %2279 = vmatprep.subr.mxu1 %v4746_v26 }
 0x3a4   : > { %2280 = vmatpush1.msra.mxu1 %v4744_v23 }
 0x3a5   : > { %2342 = vrot.lane.b32.xlu0 %v4744_v23, %s4247_s27  ;;  %4080 = vmatmul.mubr.msk.f32.vlgmr.msra.gmra.mxu1 %vm476_vm1, %v472_v27 }
 0x3a6   : > { %2319 = vmatprep.mubr.f32.mxu1 %v4245_v0 }
 0x3a7   : > { %2344 = vrot.lane.b32.xlu1 %v4746_v26, %s4247_s27 }
 0x3a9   : > { %2506 = vrot.lane.b32.xlu0 %v4744_v23, %s4249_s11  ;;  %4081 = vmatmul.mubr.msk.f32.gmra.mxu1 %vm476_vm1, %v473_v28 }
 0x3aa   : > { %2581 = vmatprep.mubr.f32.mxu1 %v4245_v0 }
 0x3ab   : > { %2508 = vrot.lane.b32.xlu1 %v4746_v26, %s4249_s11 }
 0x3ad   : > { %2590 = vrot.lane.b32.xlu0 %v4744_v23, %s5118_s25 }
 0x3af   : > { %2592 = vrot.lane.b32.xlu1 %v4746_v26, %s5118_s25  ;;  %s5127_s25 = smov 1  }
 0x3b1   : > { %2750 = vrot.lane.b32.xlu0 %v4744_v23, %s5126_s30 }
 0x3b3   : > { %2752 = vrot.lane.b32.xlu1 %v4746_v26, %s5126_s30 }
 0x3b5   : > { %2834 = vrot.lane.b32.xlu0 %v4744_v23, %s5123_s21 }
 0x3b7   : > { %2836 = vrot.lane.b32.xlu1 %v4746_v26, %s5123_s21 }
 0x3b9   : > { %2918 = vrot.lane.b32.xlu0 %v4744_v23, %s5124_s26 }
 0x3bb   : > { %2920 = vrot.lane.b32.xlu1 %v4746_v26, %s5124_s26 }
 0x3bd   : > { %3002 = vrot.lane.b32.xlu0 %v4744_v23, %s5125_s12 }
 0x3bf   : > { %3004 = vrot.lane.b32.xlu1 %v4746_v26, %s5125_s12 }
 0x3c1   : > { %3088 = vperm.xlu0 %4181, %v4091_v29  }
 0x413   : > { %v2351_v30 = vpop.permute.xlu0 %2350 }
 0x415   : > { %v2353_v32 = vpop.permute.xlu1 %2352 }
 0x416   : > { %v2354_v35 = vsel %vm676_vm2, %v2351_v30, %v2353_v32  ;;  %v2355_v40 = vsel %vm676_vm2, %v2353_v32, %v2351_v30 }
 0x417   : > { %v2356_v41 = vmul.f32 %v2355_v40, %v4461_v37  ;;  %v2357_v42 = vmul.f32 %v2354_v35, %v4464_v38  ;;  %v2343_v43 = vpop.permute.xlu0 %2342  ;;  %v4088_v40 = vld [vmem:[%s5103_s4 + $0x78] sm:$0xff] }
 0x419   : > { %2391 = vmatprep.subr.mxu0 %v2357_v42  ;;  %v2345_v34 = vpop.permute.xlu1 %2344 }
 0x41a   : > { %v2346_v46 = vsel %vm659_vm3, %v2343_v43, %v2345_v34  ;;  %v2347_v49 = vsel %vm659_vm3, %v2345_v34, %v2343_v43  ;;  %2392 = vmatpush1.msra.mxu0 %v2356_v41 }
 0x41b   : > { %v2348_v50 = vmul.f32 %v2347_v49, %v4476_v47  ;;  %v2349_v51 = vmul.f32 %v2346_v46, %v4479_v48  ;;  %v2507_v52 = vpop.permute.xlu0 %2506  ;;  %4092 = vmatmul.mubr.msk.f32.vlgmr.msra.gmra.mxu0 %vm476_vm1, %v4083_v33  ;;  %v4089_v46 = vld [vmem:[%s5103_s4 + $0x80] sm:$0xff] }
 0x41c   : > { %2499 = vmatprep.mubr.f32.mxu0 %v4245_v0 }
 0x41d   : > { %2465 = vmatprep.subr.mxu0 %v2349_v51  ;;  %v2509_v55 = vpop.permute.xlu1 %2508 }
 0x41e   : > { %v2510_v56 = vsel %vm841_vm4, %v2507_v52, %v2509_v55  ;;  %v2511_v58 = vsel %vm841_vm4, %v2509_v55, %v2507_v52  ;;  %2466 = vmatpush1.msra.mxu0 %v2348_v50 }
 0x41f   : > { %v2512_v60 = vmul.f32 %v2511_v58, %v4490_v54  ;;  %v2513_v61 = vmul.f32 %v2510_v56, %v4495_v57  ;;  %v2591_v1 = vpop.permute.xlu0 %2590  ;;  %4093 = vmatmul.mubr.msk.f32.vlgmr.msra.gmra.mxu0 %vm476_vm1, %v4082_v53  ;;  %v4090_v56 = vld [vmem:[%s5103_s4 + $0x88] sm:$0xff] }
 0x420   : > { %2665 = vmatprep.mubr.f32.mxu0 %v4245_v0 }
 0x421   : > { %v2593_v7 = vpop.permute.xlu1 %2592  ;;  %2547 = vmatprep.subr.mxu1 %v2513_v61 }
 0x422   : > { %v2594_v8 = vsel %vm934_vm5, %v2591_v1, %v2593_v7  ;;  %v2595_v9 = vsel %vm934_vm5, %v2593_v7, %v2591_v1  ;;  %2548 = vmatpush1.msra.mxu1 %v2512_v60  ;;  %v635_v60 = vadd.f32 %v4624_v63, %v4628_v3 }
 0x423   : > { %v2596_v12 = vmul.f32 %v2595_v9, %v4512_v4  ;;  %v2597_v13 = vmul.f32 %v2594_v8, %v4515_v5  ;;  %v2751_v15 = vpop.permute.xlu0 %2750  ;;  %2707 = vmatprep.subr.mxu1 %v4746_v26  ;;  %4094 = vmatmul.mubr.msk.f32.vlgmr.msra.gmra.mxu1 %vm476_vm1, %v4084_v6  ;;  %v4087_v26 = vld [vmem:[%s5103_s4 + $0x70] sm:$0xff] }
 0x424   : > { %2708 = vmatpush1.msra.mxu1 %v4744_v23  ;;  %2741 = vmatprep.mubr.f32.mxu1 %v4245_v0 }
 0x425   : > { %2631 = vmatprep.subr.mxu0 %v2597_v13  ;;  %v2753_v19 = vpop.permute.xlu1 %2752 }
 0x426   : > { %v2754_v20 = vsel %vm1103_vm6, %v2751_v15, %v2753_v19  ;;  %v2755_v21 = vsel %vm1103_vm6, %v2753_v19, %v2751_v15  ;;  %2632 = vmatpush1.msra.mxu0 %v2596_v12 }
 0x427   : > { %v2756_v22 = vmul.f32 %v2754_v20, %v4527_v10  ;;  %v2757_v23 = vmul.f32 %v2755_v21, %v4536_v14  ;;  %v2835_v25 = vpop.permute.xlu0 %2834  ;;  %4095 = vmatmul.mubr.msk.f32.vlgmr.msra.gmra.mxu0 %vm476_vm1, %v4085_v16  ;;  %4096 = vmatmul.mubr.msk.f32.vlgmr.msra.gmra.mxu1 %vm476_vm1, %v4086_v18 }
 0x428   : > { %2825 = vmatprep.mubr.f32.mxu0 %v4245_v0  ;;  %2909 = vmatprep.mubr.f32.mxu1 %v4245_v0 }
 0x429   : > { %2791 = vmatprep.subr.mxu0 %v2757_v23  ;;  %v2837_v27 = vpop.permute.xlu1 %2836 }
 0x42a   : > { %v2838_v28 = vsel %vm1196_vm7, %v2835_v25, %v2837_v27  ;;  %v2839_v29 = vsel %vm1196_vm7, %v2837_v27, %v2835_v25  ;;  %2792 = vmatpush1.msra.mxu0 %v2756_v22 }
 0x42b   : > { %v2840_v30 = vmul.f32 %v2838_v28, %v4552_v17  ;;  %v2841_v32 = vmul.f32 %v2839_v29, %v4558_v24  ;;  %v2919_v35 = vpop.permute.xlu0 %2918  ;;  %4097 = vmatmul.mubr.msk.f32.vlgmr.msra.gmra.mxu0 %vm476_vm1, %v4087_v26 }
 0x42c   : > { %2993 = vmatprep.mubr.f32.mxu0 %v4245_v0 }
 0x42d   : > { %v2921_v41 = vpop.permute.xlu1 %2920  ;;  %2875 = vmatprep.subr.mxu1 %v2841_v32 }
 0x42e   : > { %v2922_v42 = vsel %vm1289_vm8, %v2919_v35, %v2921_v41  ;;  %v2923_v43 = vsel %vm1289_vm8, %v2921_v41, %v2919_v35  ;;  %2876 = vmatpush1.msra.mxu1 %v2840_v30 }
 0x42f   : > { %v2924_v33 = vmul.f32 %v2922_v42, %v4576_v36  ;;  %v2925_v34 = vmul.f32 %v2923_v43, %v4579_v39  ;;  %4098 = vmatmul.mubr.msk.f32.vlgmr.msra.gmra.mxu1 %vm476_vm1, %v4088_v40  ;;  %v3003_v49 = vpop.permute.xlu0 %3002 }
 0x430   : > { %3077 = vmatprep.mubr.f32.mxu1 %v4245_v0 }
 0x431   : > { %2959 = vmatprep.subr.mxu0 %v2925_v34  ;;  %v3005_v50 = vpop.permute.xlu1 %3004 }
 0x432   : > { %v3006_v51 = vsel %vm1382_vm9, %v3003_v49, %v3005_v50  ;;  %v3007_v52 = vsel %vm1382_vm9, %v3005_v50, %v3003_v49  ;;  %2960 = vmatpush1.msra.mxu0 %v2924_v33 }
 0x433   : > { %v3008_v53 = vmul.f32 %v4596_v44, %v3006_v51  ;;  %v3009_v55 = vmul.f32 %v4601_v45, %v3007_v52  ;;  %4099 = vmatmul.mubr.msk.f32.vlgmr.msra.gmra.mxu0 %vm476_vm1, %v4089_v46 }
 0x434   : > { %3190 = vmatprep.mubr.f32.mxu0 %v4245_v0 }
 0x435   : > { %3043 = vmatprep.subr.mxu1 %v3009_v55 }
 0x436   : > { %3044 = vmatpush1.msra.mxu1 %v3008_v53 }
 0x437   : > { %4100 = vmatmul.mubr.msk.f32.vlgmr.msra.gmra.mxu1 %vm476_vm1, %v4090_v56 }
 0x438   : > { %3264 = vmatprep.mubr.f32.mxu1 %v4245_v0 }
 0x43c   : > { %v3089_v52 = vpop.permute.xlu0 %3088 }
 0x465   : > { %v2315_v58 = vpop.f32.mrf.mxu1 }
 0x466   : > { %v4893_v61 = vadd.f32 %v2315_v58, %v4622_v62 }
 0x467   : > { %v2317_v1 = vpop.f32.mrf.mxu1 }
 0x468   : > { %v4895_v6 = vadd.f32 %v2317_v1, %v635_v60 }
 0x469   : > { %v2321_v7 = vpop.f32.mrf.mxu1 }
 0x46a   : > { %v4898_v8 = vadd.f32 %v2321_v7, %v4626_v2  ;;  %v4110_v7 = vld [vmem:[%s5106_s7 + $0x8] sm:$0xff] }
 0x46b   : > { %v4900_v16 = vpop.f32.mrf.mxu1 }
 0x4db   : > { %v2427_v9 = vpop.f32.mrf.mxu0 }
 0x4dd   : > { %v2429_v12 = vpop.f32.mrf.mxu0 }
 0x4df   : > { %v2501_v13 = vpop.f32.mrf.mxu0 }
 0x4e0   : > { %v2502_v15 = vadd.f32 %v2501_v13, %v2427_v9  ;;  %v3947_v9 = vld [vmem:[%s5108_s9] sm:$0xff] }
 0x4e1   : > { %v2503_v18 = vpop.f32.mrf.mxu0 }
 0x4e2   : > { %v2504_v20 = vadd.f32 %v2503_v18, %v2429_v12  ;;  %v3948_v12 = vld [vmem:[%s5108_s9 + $0x8] sm:$0xff] }
 0x4e3   : > { %v2583_v19 = vpop.f32.mrf.mxu1 }
 0x4e4   : > { %v2588_v63 = vadd.f32 %v2583_v19, %v2502_v15 }
 0x4e5   : > { %v2585_v3 = vpop.f32.mrf.mxu1 }
 0x4e6   : > { %v2589_v21 = vadd.f32 %v2585_v3, %v2504_v20 }
 0x4e7   : > { %v2667_v62 = vpop.f32.mrf.mxu0  ;;  %v2743_v25 = vpop.f32.mrf.mxu1 }
 0x4e8   : > { %v2672_v22 = vadd.f32 %v2667_v62, %v2588_v63  ;;  %v4102_v62 = vld [vmem:[%s5105_s6 + $0x50] sm:$0xff] }
 0x4e9   : > { %v2669_v23 = vpop.f32.mrf.mxu0  ;;  %v2745_v2 = vpop.f32.mrf.mxu1 }
 0x4ea   : > { %v2673_v26 = vadd.f32 %v2669_v23, %v2589_v21  ;;  %v2748_v27 = vadd.f32 %v2743_v25, %v2672_v22 }
 0x4eb   : > { %v2827_v28 = vpop.f32.mrf.mxu0 }
 0x4ec   : > { %v2749_v30 = vadd.f32 %v2745_v2, %v2673_v26  ;;  %v2832_v32 = vadd.f32 %v2827_v28, %v2748_v27 }
 0x4ed   : > { %v2829_v35 = vpop.f32.mrf.mxu0 }
 0x4ee   : > { %v2833_v42 = vadd.f32 %v2829_v35, %v2749_v30  ;;  %v4103_v30 = vld [vmem:[%s5105_s6 + $0x58] sm:$0xff] }
 0x4ef   : > { %v2911_v29 = vpop.f32.mrf.mxu1 }
 0x4f0   : > { %v2916_v43 = vadd.f32 %v2911_v29, %v2832_v32 }
 0x4f1   : > { %v2913_v40 = vpop.f32.mrf.mxu1 }
 0x4f2   : > { %v2917_v34 = vadd.f32 %v2913_v40, %v2833_v42  ;;  %v4104_v42 = vld [vmem:[%s5105_s6 + $0x60] sm:$0xff] }
 0x4f3   : > { %v2995_v41 = vpop.f32.mrf.mxu0 }
 0x4f4   : > { %v3000_v46 = vadd.f32 %v2995_v41, %v2916_v43  ;;  %v4105_v43 = vld [vmem:[%s5105_s6 + $0x68] sm:$0xff] }
 0x4f5   : > { %v2997_v33 = vpop.f32.mrf.mxu0 }
 0x4f6   : > { %v3001_v50 = vadd.f32 %v2997_v33, %v2917_v34 }
 0x4f7   : > { %v3079_v49 = vpop.f32.mrf.mxu1 }
 0x4f8   : > { %v3084_v51 = vadd.f32 %v3079_v49, %v3000_v46 }
 0x4f9   : > { %v3081_v53 = vpop.f32.mrf.mxu1 }
 0x4fa   : > { %v3091_v55 = vadd.f32 %v3089_v52, %v3084_v51  ;;  %v3085_v56 = vadd.f32 %v3081_v53, %v3001_v50  ;;  %v4106_v50 = vld [vmem:[%s5105_s6 + $0x70] sm:$0xff] }
 0x4fc   : > { %v4902_v58 = vmax.f32 %v3091_v55, 0.0  ;;  %v3092_v60 = vadd.f32 %v3089_v52, %v3085_v56  ;;  %v4107_v56 = vld [vmem:[%s5105_s6 + $0x78] sm:$0xff] }
 0x4fe   : > { %v3094_v1 = vmax.f32 %v3092_v60, 0.0  ;;  %3115 = vrot.lane.b32.xlu1 %v4902_v58, %s5120_s28 }
 0x500   : > { %3117 = vrot.lane.b32.xlu0 %v3094_v1, %s5120_s28 }
 0x502   : > { %3107 = vrot.lane.b32.xlu1 %v4902_v58, %s4247_s27 }
 0x504   : > { %3109 = vrot.lane.b32.xlu0 %v3094_v1, %s4247_s27 }
 0x506   : > { %3271 = vrot.lane.b32.xlu1 %v4902_v58, %s4249_s11 }
 0x508   : > { %3273 = vrot.lane.b32.xlu0 %v3094_v1, %s4249_s11 }
 0x50a   : > { %3355 = vrot.lane.b32.xlu1 %v4902_v58, %s5127_s25 }
 0x50c   : > { %3357 = vrot.lane.b32.xlu0 %v3094_v1, %s5127_s25  ;;  %s4051_s25 = sshll.u32 %s350_s29, 5 }
 0x50d   : > { %s352_s27 = scalar_lea.vmem [#allocation2], %s4051_s25 }
 0x50e   : > { %3515 = vrot.lane.b32.xlu1 %v4902_v58, %s5126_s30  ;;  %s3985_s11 = sshll.u32 %s352_s27, 4  ;;  %s5049_s11 = int_to_ptr.vmem [resolvable:$true] %s3985_s11 }
 0x510   : > { %3517 = vrot.lane.b32.xlu0 %v3094_v1, %s5126_s30  ;;  %s4128_s30 = sshll.u32 %s4333_s17, 9  ;;  %s4183_s17 = scalar_lea.vmem %s5049_s11, 512 }
 0x511   : > { %s5054_s20 = scalar_lea.hbm %s5109_s10, %s4128_s30  ;;  %p4184_p11 = scmp.ne.s32.totalorder %s5049_s11, %s4183_s17 }
 0x512   : > { %3599 = vrot.lane.b32.xlu1 %v4902_v58, %s5123_s21 }
 0x513   : > { %p4185_p12 = pnand %p4184_p11, %p4350_p5 }
 0x514   : > { %3601 = vrot.lane.b32.xlu0 %v3094_v1, %s5123_s21 }
 0x515   : > { %p4186_p13 = pneg %p4185_p12 }
 0x516   : > { %3683 = vrot.lane.b32.xlu1 %v4902_v58, %s5124_s26 }
 0x518   : > { %3685 = vrot.lane.b32.xlu0 %v3094_v1, %s5124_s26  ;;  %s5058_s26 = scalar_lea.sflag [#allocation3], %s350_s29 }
 0x51a   : > { %3767 = vrot.lane.b32.xlu1 %v4902_v58, %s5125_s12 }
 0x51c   : > { %3769 = vrot.lane.b32.xlu0 %v3094_v1, %s5125_s12  ;;  %s4255_s12 = smov [#allocation2]  }
 0x51d   : > { %s4187_s25 = sshll.u32 %s4255_s12, 4  ;;  %s4188_s25 = int_to_ptr.vmem [resolvable:$false] %s4187_s25 }
 0x51e   : > { %3853 = vperm.xlu1 %4182, %v4110_v7   ;;  %v4108_v7 = vld [vmem:[%s5105_s6 + $0x80] sm:$0xff]  ;;  %s4189_s28 = scalar_lea.vmem %s4188_s25, 1024  ;;  %p4190_p0 = scmp.lt.s32.totalorder %s5049_s11, %s4188_s25 }
 0x51f   : > { %p4191_p1 = scmp.lt.s32.totalorder %s4189_s28, %s4183_s17 }
 0x520   : > { %3951 = vperm.xlu0 %4181, %v3947_v9  }
 0x521   : > { %p4192_p2 = por %p4191_p1, %p4190_p0 }
 0x522   : > { %3956 = vperm.xlu1 %4182, %v3948_v12  }
 0x523   : > { %p4193_p3 = pnand %p4192_p2, %p4186_p13 }
 0x570   : > { %v3116_v13 = vpop.permute.xlu1 %3115 }
 0x572   : > { %v3118_v15 = vpop.permute.xlu0 %3117 }
 0x573   : > { %v3119_v18 = vsel %vm676_vm2, %v3116_v13, %v3118_v15  ;;  %v3120_v19 = vsel %vm676_vm2, %v3118_v15, %v3116_v13 }
 0x574   : > { %v3121_v20 = vmul.f32 %v3120_v19, %v4461_v37  ;;  %v3122_v63 = vmul.f32 %v3119_v18, %v4464_v38  ;;  %v3108_v3 = vpop.permute.xlu1 %3107  ;;  %v4101_v38 = vld [vmem:[%s5105_s6 + $0x48] sm:$0xff] }
 0x575   : > { %v4109_v18 = vld [vmem:[%s5105_s6 + $0x88] sm:$0xff] }
 0x576   : > { %3156 = vmatprep.subr.mxu0 %v3122_v63  ;;  %v3110_v21 = vpop.permute.xlu0 %3109 }
 0x577   : > { %v3111_v22 = vsel %vm659_vm3, %v3108_v3, %v3110_v21  ;;  %v3112_v23 = vsel %vm659_vm3, %v3110_v21, %v3108_v3  ;;  %3157 = vmatpush1.msra.mxu0 %v3121_v20 }
 0x578   : > { %v3113_v25 = vmul.f32 %v3112_v23, %v4476_v47  ;;  %v3114_v37 = vmul.f32 %v3111_v22, %v4479_v48  ;;  %v3272_v26 = vpop.permute.xlu1 %3271  ;;  %4111 = vmatmul.mubr.msk.f32.vlgmr.msra.gmra.mxu0 %vm476_vm1, %v4102_v62 }
 0x579   : > { %3346 = vmatprep.mubr.f32.mxu0 %v4245_v0 }
 0x57a   : > { %3230 = vmatprep.subr.mxu1 %v3114_v37  ;;  %v3274_v27 = vpop.permute.xlu0 %3273 }
 0x57b   : > { %v3275_v2 = vsel %vm841_vm4, %v3272_v26, %v3274_v27  ;;  %v3276_v28 = vsel %vm841_vm4, %v3274_v27, %v3272_v26  ;;  %3231 = vmatpush1.msra.mxu1 %v3113_v25 }
 0x57c   : > { %v3277_v47 = vmul.f32 %v3276_v28, %v4490_v54  ;;  %v3278_v48 = vmul.f32 %v3275_v2, %v4495_v57  ;;  %v3356_v29 = vpop.permute.xlu1 %3355  ;;  %4112 = vmatmul.mubr.msk.f32.vlgmr.msra.gmra.mxu1 %vm476_vm1, %v4101_v38 }
 0x57d   : > { %3430 = vmatprep.mubr.f32.mxu1 %v4245_v0 }
 0x57e   : > { %3312 = vmatprep.subr.mxu0 %v3278_v48  ;;  %v3358_v32 = vpop.permute.xlu0 %3357 }
 0x57f   : > { %v3359_v35 = vsel %vm934_vm5, %v3356_v29, %v3358_v32  ;;  %v3360_v40 = vsel %vm934_vm5, %v3358_v32, %v3356_v29  ;;  %3313 = vmatpush1.msra.mxu0 %v3277_v47 }
 0x580   : > { %v3361_v54 = vmul.f32 %v3360_v40, %v4512_v4  ;;  %v3362_v57 = vmul.f32 %v3359_v35, %v4515_v5  ;;  %v3516_v41 = vpop.permute.xlu1 %3515  ;;  %3472 = vmatprep.subr.mxu0 %v3094_v1  ;;  %4113 = vmatmul.mubr.msk.f32.vlgmr.msra.gmra.mxu0 %vm476_vm1, %v4103_v30 }
 0x581   : > { %3473 = vmatpush1.msra.mxu0 %v4902_v58  ;;  %3506 = vmatprep.mubr.f32.mxu0 %v4245_v0 }
 0x582   : > { %3396 = vmatprep.subr.mxu1 %v3362_v57  ;;  %v3518_v4 = vpop.permute.xlu0 %3517 }
 0x583   : > { %v3519_v5 = vsel %vm1103_vm6, %v3516_v41, %v3518_v4  ;;  %v3520_v33 = vsel %vm1103_vm6, %v3518_v4, %v3516_v41  ;;  %3397 = vmatpush1.msra.mxu1 %v3361_v54 }
 0x584   : > { %v3521_v34 = vmul.f32 %v3519_v5, %v4527_v10  ;;  %v3522_v46 = vmul.f32 %v3520_v33, %v4536_v14  ;;  %v3600_v49 = vpop.permute.xlu1 %3599  ;;  %4114 = vmatmul.mubr.msk.f32.vlgmr.msra.gmra.mxu1 %vm476_vm1, %v4104_v42  ;;  %4115 = vmatmul.mubr.msk.f32.vlgmr.msra.gmra.mxu0 %vm476_vm1, %v4105_v43 }
 0x585   : > { %3590 = vmatprep.mubr.f32.mxu1 %v4245_v0  ;;  %3674 = vmatprep.mubr.f32.mxu0 %v4245_v0 }
 0x586   : > { %3556 = vmatprep.subr.mxu1 %v3522_v46  ;;  %v3602_v51 = vpop.permute.xlu0 %3601 }
 0x587   : > { %v3603_v10 = vsel %vm1196_vm7, %v3600_v49, %v3602_v51  ;;  %v3604_v14 = vsel %vm1196_vm7, %v3602_v51, %v3600_v49  ;;  %3557 = vmatpush1.msra.mxu1 %v3521_v34 }
 0x588   : > { %v3605_v52 = vmul.f32 %v3603_v10, %v4552_v17  ;;  %v3606_v53 = vmul.f32 %v3604_v14, %v4558_v24  ;;  %v3684_v55 = vpop.permute.xlu1 %3683  ;;  %4116 = vmatmul.mubr.msk.f32.vlgmr.msra.gmra.mxu1 %vm476_vm1, %v4106_v50  ;;  %v474_v14 = vld [vmem:[%s5107_s8 + $0x30] sm:$0xff] }
 0x589   : > { %3758 = vmatprep.mubr.f32.mxu1 %v4245_v0 }
 0x58a   : > { %3640 = vmatprep.subr.mxu0 %v3606_v53  ;;  %v3686_v58 = vpop.permute.xlu0 %3685 }
 0x58b   : > { %v3687_v60 = vsel %vm1289_vm8, %v3684_v55, %v3686_v58  ;;  %v3688_v1 = vsel %vm1289_vm8, %v3686_v58, %v3684_v55  ;;  %3641 = vmatpush1.msra.mxu0 %v3605_v52  ;;  %v475_v52 = vld [vmem:[%s5107_s8 + $0x38] sm:$0xff] }
 0x58c   : > { %v3689_v17 = vmul.f32 %v3687_v60, %v4576_v36  ;;  %v3690_v24 = vmul.f32 %v3688_v1, %v4579_v39  ;;  %4117 = vmatmul.mubr.msk.f32.vlgmr.msra.gmra.mxu0 %vm476_vm1, %v4107_v56  ;;  %v3768_v9 = vpop.permute.xlu1 %3767  ;;  %v641_v60 = vadd.f32 %v4630_v11, %v4620_v59 }
 0x58d   : > { %3842 = vmatprep.mubr.f32.mxu0 %v4245_v0 }
 0x58e   : > { %3724 = vmatprep.subr.mxu1 %v3690_v24  ;;  %v3770_v12 = vpop.permute.xlu0 %3769  ;;  %v2329_v24 = vadd.f32 %v4900_v16, %v641_v60 }
 0x58f   : > { %v3771_v13 = vsel %vm1382_vm9, %v3768_v9, %v3770_v12  ;;  %v3772_v15 = vsel %vm1382_vm9, %v3770_v12, %v3768_v9  ;;  %3725 = vmatpush1.msra.mxu1 %v3689_v17 }
 0x590   : > { %v3773_v36 = vmul.f32 %v4596_v44, %v3771_v13  ;;  %v3774_v39 = vmul.f32 %v4601_v45, %v3772_v15  ;;  %4118 = vmatmul.mubr.msk.f32.vlgmr.msra.gmra.mxu1 %vm476_vm1, %v4108_v7 }
 0x591   : > { %3930 = vmatprep.mubr.f32.mxu1 %v4245_v0 }
 0x592   : > { %3808 = vmatprep.subr.mxu0 %v3774_v39 }
 0x593   : > { %3809 = vmatpush1.msra.mxu0 %v3773_v36 }
 0x594   : > { %4119 = vmatmul.mubr.msk.f32.vlgmr.msra.gmra.mxu0 %vm476_vm1, %v4109_v18 }
 0x599   : > { %v3854_v34 = vpop.permute.xlu1 %3853 }
 0x59b   : > { %v3952_v56 = vpop.permute.xlu0 %3951 }
 0x59d   : > { %v3957_v13 = vpop.permute.xlu1 %3956 }
 0x638   : > { %v3192_v19 = vpop.f32.mrf.mxu0 }
 0x63a   : > { %v3194_v31 = vpop.f32.mrf.mxu0 }
 0x63c   : > { %v3266_v20 = vpop.f32.mrf.mxu1 }
 0x63d   : > { %v3267_v63 = vadd.f32 %v3266_v20, %v3192_v19 }
 0x63e   : > { %v3268_v3 = vpop.f32.mrf.mxu1 }
 0x63f   : > { %v3269_v44 = vadd.f32 %v3268_v3, %v3194_v31 }
 0x640   : > { %v3348_v62 = vpop.f32.mrf.mxu0 }
 0x641   : > { %v3353_v45 = vadd.f32 %v3348_v62, %v3267_v63 }
 0x642   : > { %v3350_v21 = vpop.f32.mrf.mxu0 }
 0x643   : > { %v3354_v22 = vadd.f32 %v3350_v21, %v3269_v44 }
 0x644   : > { %v3432_v23 = vpop.f32.mrf.mxu1  ;;  %v3508_v25 = vpop.f32.mrf.mxu0 }
 0x645   : > { %v3437_v37 = vadd.f32 %v3432_v23, %v3353_v45 }
 0x646   : > { %v3434_v26 = vpop.f32.mrf.mxu1  ;;  %v3510_v2 = vpop.f32.mrf.mxu0 }
 0x647   : > { %v3438_v38 = vadd.f32 %v3434_v26, %v3354_v22  ;;  %v3513_v27 = vadd.f32 %v3508_v25, %v3437_v37 }
 0x648   : > { %v3592_v28 = vpop.f32.mrf.mxu1 }
 0x649   : > { %v3514_v47 = vadd.f32 %v3510_v2, %v3438_v38  ;;  %v3597_v48 = vadd.f32 %v3592_v28, %v3513_v27 }
 0x64a   : > { %v3594_v29 = vpop.f32.mrf.mxu1 }
 0x64b   : > { %v3598_v32 = vadd.f32 %v3594_v29, %v3514_v47 }
 0x64c   : > { %v3676_v30 = vpop.f32.mrf.mxu0 }
 0x64d   : > { %v3681_v35 = vadd.f32 %v3676_v30, %v3597_v48 }
 0x64e   : > { %v3678_v40 = vpop.f32.mrf.mxu0 }
 0x64f   : > { %v3682_v41 = vadd.f32 %v3678_v40, %v3598_v32 }
 0x650   : > { %v3760_v54 = vpop.f32.mrf.mxu1 }
 0x651   : > { %v3765_v42 = vadd.f32 %v3760_v54, %v3681_v35 }
 0x652   : > { %v3762_v57 = vpop.f32.mrf.mxu1 }
 0x653   : > { %v3766_v4 = vadd.f32 %v3762_v57, %v3682_v41 }
 0x654   : > { %v3844_v43 = vpop.f32.mrf.mxu0 }
 0x655   : > { %v3849_v5 = vadd.f32 %v3844_v43, %v3765_v42 }
 0x656   : > { %v3846_v33 = vpop.f32.mrf.mxu0 }
 0x657   : > { %v3850_v46 = vadd.f32 %v3846_v33, %v3766_v4  ;;  %v3856_v49 = vadd.f32 %v3854_v34, %v3849_v5 }
 0x659   : > { %v3857_v50 = vadd.f32 %v3854_v34, %v3850_v46  ;;  %v3858_v10 = vmax.f32 %v3856_v49, 0.0 }
 0x65b   : > { %v3859_v51 = vmax.f32 %v3857_v50, 0.0 }
 0x65d   : > { %3896 = vmatprep.subr.mxu1 %v3859_v51 }
 0x65e   : > { %3897 = vmatpush1.msra.mxu1 %v3858_v10 }
 0x65f   : > { %4120 = vmatmul.mubr.msk.f32.vlgmr.msra.gmra.mxu1 %vm476_vm1, %v474_v14 }
 0x660   : > { %3936 = vmatprep.mubr.f32.mxu1 %v4245_v0 }
 0x663   : > { %4121 = vmatmul.mubr.msk.f32.gmra.mxu1 %vm476_vm1, %v475_v52 }
 0x71f   : > { %v3932_v53 = vpop.f32.mrf.mxu1 }
 0x720   : > { %v3943_v55 = vadd.f32 %v3932_v53, %v4893_v61 }
 0x721   : > { %v3934_v58 = vpop.f32.mrf.mxu1 }
 0x722   : > { %v3959_v1 = vadd.f32 %v3952_v56, %v3943_v55  ;;  %v3944_v0 = vadd.f32 %v3934_v58, %v4895_v6 }
 0x723   : > { %v3938_v17 = vpop.f32.mrf.mxu1 }
 0x724   : > { %v3963_v7 = vmax.f32 %v3959_v1, 0.0  ;;  %v3960_v9 = vadd.f32 %v3952_v56, %v3944_v0  ;;  %v3945_v12 = vadd.f32 %v3938_v17, %v4898_v8 }
 0x725   : > { %v3940_v15 = vpop.f32.mrf.mxu1 }
 0x726   : > { %3967 = vst [vmem:[%s352_s27] sm:$0xff] %v3963_v7  ;;  %v3964_v61 = vmax.f32 %v3960_v9, 0.0  ;;  %v3961_v59 = vadd.f32 %v3957_v13, %v3945_v12  ;;  %v3946_v11 = vadd.f32 %v3940_v15, %v2329_v24 }
 0x728   : > { %3968 = vst [vmem:[%s352_s27 + $0x8] sm:$0xff] %v3964_v61  ;;  %v3965_v6 = vmax.f32 %v3961_v59, 0.0  ;;  %v3962_v36 = vadd.f32 %v3957_v13, %v3946_v11 }
 0x72a   : > { %3969 = vst [vmem:[%s352_s27 + $0x10] sm:$0xff] %v3965_v6  ;;  %v3966_v8 = vmax.f32 %v3962_v36, 0.0 }
 0x72c   : > { %3970 = vst [vmem:[%s352_s27 + $0x18] sm:$0xff] %v3966_v8 }
 0x72d   : > { %4196 = shalt.err (!%p4193_p3)
}
 0x72e   : > { %s4197_s29 = scalar_lea.hbm %s5054_s20, 512  ;;  %s4201_s18 = scalar_lea.hbm %s5109_s10, 1024 }
 0x72f   : > { %p4198_p4 = scmp.ne.s32.totalorder %s5054_s20, %s4197_s29  ;;  %p4202_p9 = scmp.lt.s32.totalorder %s5054_s20, %s5109_s10 }
 0x730   : > { %p4203_p10 = scmp.lt.s32.totalorder %s4201_s18, %s4197_s29 }
 0x731   : > { %p4199_p7 = pnand %p4198_p4, %p4350_p5 }
 0x732   : > { %p4204_p11 = por %p4203_p10, %p4202_p9 }
 0x733   : > { %p4200_p8 = pneg %p4199_p7 }
 0x735   : > { %p4205_p12 = pnand %p4204_p11, %p4200_p8 }
 0x737   : > { %4208 = shalt.err (!%p4205_p12)
}
 0x738   : > { %s4256_s28 = smov 256   ;;  %s5128_s17 = smov 16  }
 0x739   : > { %4131 = dma.vmem_to_hbm [thread:$0]  (%p4350_p5), %s5049_s11, 512, %s5054_s20, %s5058_s26, %s4256_s28, %s4256_s28, %s5128_s17  }
 0x73a PF: > { %p4137_p13 = scmp.ge.s32.totalorder %s4243_s16, 2  ;;  %s4000_s25 = sand.u32 1, %s4231_s13  }
 0x73b   : > { %s4001_s29 = scalar_lea.sflag [#allocation3], %s4000_s25 }
 0x73c   : > { %p4134_p0 = pnand %p4137_p13, %p4354_p6 }
 0x73e   : > { %p4135_p1 = pneg %p4134_p0 }
 0x740   : > { %4226 = dma.done.wait (%p4135_p1), %s4001_s29, 512  }
 0x741   : > { %4228 = vsyncadd (%p4135_p1), %s4001_s29, 4294966784  ;;  %p20_p2 = scmp.ge.s32.totalorder %s4337_s19, 4   ;;  %s5129_s13 = smov %s4235_s14 }
 0x742   : > { %s5130_s14 = smov %s4239_s15  ;;  %s5131_s15 = smov %s4348_s22 }
 0x743   : > { %s5132_s16 = smov %s4337_s19  ;;  %22 = sbr.rel (!%p20_p2) target bundleno = 3 (0x3), region = 99 }
 0x748   :  { %4006 = vsyncpa [#allocation3], 1 }
 0x749   :  { %4008 = vsyncpa [#allocation3 + $0x1], 1 }

</bundles_post_ra>
